<compile_context>
chip_gen: v7x
topology: tpu7x:2x2x1
jax: 0.10.0
libtpu: 0.0.40
codegen_flags: <defaults>
</compile_context>

<pallas_src>
import functools
import math
from collections import namedtuple

import numpy as np
import jax
import jax.numpy as jnp
from jax import lax
from jax.experimental import pallas as pl
from jax.experimental.pallas import tpu as pltpu

Sample = namedtuple("Sample", "sample chains")

NCOEF = 5  # [sqrt_recip_ac, sqrt_recipm1_ac, post_mean_c1, post_mean_c2, post_std*temp]


# ---------------------------------------------------------------------------
# Schedule (cosine_beta_schedule, identical math to the torch reference)
# ---------------------------------------------------------------------------
def cosine_beta_schedule(timesteps: int, s: float = 0.008) -> np.ndarray:
    steps = timesteps + 1
    x = np.linspace(0, timesteps, steps, dtype=np.float64)
    alphas_cumprod = np.cos(((x / timesteps) + s) / (1 + s) * math.pi * 0.5) ** 2
    alphas_cumprod = alphas_cumprod / alphas_cumprod[0]
    betas = 1.0 - (alphas_cumprod[1:] / alphas_cumprod[:-1])
    return np.clip(betas, 0.0, 0.999)


def make_diffusion_buffers(n_timesteps: int):
    betas = cosine_beta_schedule(n_timesteps)
    alphas = 1.0 - betas
    alphas_cumprod = np.cumprod(alphas, axis=0)
    alphas_cumprod_prev = np.concatenate([np.ones(1), alphas_cumprod[:-1]])

    bufs = {
        "betas": betas,
        "sqrt_recip_alphas_cumprod": np.sqrt(1.0 / alphas_cumprod),
        "sqrt_recipm1_alphas_cumprod": np.sqrt(1.0 / alphas_cumprod - 1.0),
        "posterior_variance": betas * (1.0 - alphas_cumprod_prev) / (1.0 - alphas_cumprod),
        "posterior_mean_coef1": betas * np.sqrt(alphas_cumprod_prev) / (1.0 - alphas_cumprod),
        "posterior_mean_coef2": (1.0 - alphas_cumprod_prev) * np.sqrt(alphas) / (1.0 - alphas_cumprod),
    }
    return {k: v.astype(np.float32) for k, v in bufs.items()}


# ---------------------------------------------------------------------------
# Fused Pallas kernel: ALL reverse-diffusion steps inside one invocation.
# Loop index g corresponds to timestep t = n_timesteps - 1 - g; all per-step
# tables are pre-reversed into that order on the host.
# ---------------------------------------------------------------------------
def _fused_p_sample_kernel(
    coef_ref,    # SMEM (N_T * NCOEF,)  flat per-step scalar coefficients
    x0_ref,      # VMEM (B, D)          initial Gaussian latent
    noise_ref,   # VMEM (N_T, B, D)     per-step Gaussian noise table
    bias_ref,    # VMEM (N_T, B, H)     cond@w1c + b1 + temb@w1t, per step
    b2_ref,      # VMEM (B, D)          output bias (pre-broadcast)
    w1x_ref,     # VMEM (D, H)          resident weight (mxu_dtype)
    w2_ref,      # VMEM (H, D)          resident weight (mxu_dtype)
    o_ref,       # VMEM (B, D)          final sample
    *,
    n_timesteps: int,
    clip_denoised: bool,
    mxu_dtype,
):
    # ---- hoisted, loop-invariant loads (once for the whole sampling loop) ----
    w1x = w1x_ref[...]
    w2 = w2_ref[...]
    b2 = b2_ref[...]
    x = x0_ref[...]

    def body(g, x):
        base = g * NCOEF
        sr = coef_ref[base + 0]    # sqrt(1 / alphas_cumprod[t])
        srm1 = coef_ref[base + 1]  # sqrt(1 / alphas_cumprod[t] - 1)
        c1 = coef_ref[base + 2]    # posterior_mean_coef1[t]
        c2 = coef_ref[base + 3]    # posterior_mean_coef2[t]
        std = coef_ref[base + 4]   # exp(0.5*log_var) * temperature, 0 at t==0

        # --- denoiser model: epsilon = MLP(x, condition, time_emb) ---
        # cond / time projections were hoisted to the host; only the
        # x-dependent matmuls run per step (f32 accumulation on the MXU).
        h = jnp.dot(x.astype(mxu_dtype), w1x, preferred_element_type=jnp.float32)
        h = jnp.maximum(h + bias_ref[g], 0.0)
        epsilon = jnp.dot(h.astype(mxu_dtype), w2,
                          preferred_element_type=jnp.float32) + b2

        # --- predict_start_from_noise (+ per-step clip of x_recon) ---
        x_recon = sr * x - srm1 * epsilon
        if clip_denoised:
            x_recon = jnp.clip(x_recon, -1.0, 1.0)

        # --- q_posterior mean + reparameterized sample ---
        model_mean = c1 * x_recon + c2 * x
        return model_mean + std * noise_ref[g]

    x = lax.fori_loop(0, n_timesteps, body, x, unroll=True)

    # Final clamp of the returned sample (reference p_sample_loop epilogue),
    # applied exactly once after the loop.
    if clip_denoised:
        x = jnp.clip(x, -1.0, 1.0)
    o_ref[...] = x


def p_sample_loop_call(coef_flat, x0, noise, bias_full, b2_full, w1x, w2,
                       *, n_timesteps: int, clip_denoised: bool, mxu_dtype):
    B, D = x0.shape
    kernel = functools.partial(
        _fused_p_sample_kernel,
        n_timesteps=n_timesteps,
        clip_denoised=clip_denoised,
        mxu_dtype=mxu_dtype,
    )
    vmem = pltpu.MemorySpace.VMEM
    return pl.pallas_call(
        kernel,
        out_shape=jax.ShapeDtypeStruct((B, D), jnp.float32),
        in_specs=[
            pl.BlockSpec(memory_space=pltpu.MemorySpace.SMEM),  # coef table
            pl.BlockSpec(memory_space=vmem),                    # x0
            pl.BlockSpec(memory_space=vmem),                    # noise table
            pl.BlockSpec(memory_space=vmem),                    # fused bias table
            pl.BlockSpec(memory_space=vmem),                    # b2 (pre-broadcast)
            pl.BlockSpec(memory_space=vmem),                    # w1x
            pl.BlockSpec(memory_space=vmem),                    # w2
        ],
        out_specs=pl.BlockSpec(memory_space=vmem),
    )(coef_flat, x0, noise, bias_full, b2_full, w1x, w2)


# ---------------------------------------------------------------------------
# GaussianDiffusion in JAX (single jitted dispatch drives the fused kernel)
# ---------------------------------------------------------------------------
class GaussianDiffusionJAX:
    def __init__(self, params, data_dim, cond_dim, temb_dim, n_timesteps=15,
                 temperature=1.0, clip_denoised=True, mxu_dtype=jnp.bfloat16):
        self.params = params
        self.data_dim = data_dim
        self.cond_dim = cond_dim
        self.temb_dim = temb_dim
        self.n_timesteps = int(n_timesteps)
        self.temperature = float(temperature)
        self.clip_denoised = bool(clip_denoised)
        self.mxu_dtype = mxu_dtype
        self.buffers = make_diffusion_buffers(self.n_timesteps)
        # guidance_scale = 0, return_chain = False (setup_sampling defaults)

        self.coef_flat = jnp.asarray(self._build_coef_table())   # (N_T * NCOEF,)
        self.temb_table = jnp.asarray(self._build_temb_table())  # (N_T, temb_dim)
        self._sample_jit = jax.jit(self._sample_impl)

    # -- precomputed per-timestep scalar table, in loop order (t = N_T-1-g) ----
    # temperature and the "noise = 0 at t == 0" case are folded into the std
    # column so the noise tensor needs no scatter / elementwise pass in HBM.
    def _build_coef_table(self):
        b = self.buffers
        order = np.arange(self.n_timesteps - 1, -1, -1)
        post_std = np.sqrt(np.clip(b["posterior_variance"], 1e-20, None))
        post_std = post_std * self.temperature
        post_std[0] = 0.0  # t == 0: no noise added (last loop iteration)
        tab = np.stack(
            [
                b["sqrt_recip_alphas_cumprod"][order],
                b["sqrt_recipm1_alphas_cumprod"][order],
                b["posterior_mean_coef1"][order],
                b["posterior_mean_coef2"][order],
                post_std[order],
            ],
            axis=1,
        ).astype(np.float32)
        return tab.reshape(-1)

    # -- sinusoidal time-embedding table, in loop order -------------------------
    def _build_temb_table(self):
        half = self.temb_dim // 2
        freqs = np.exp(-math.log(10000.0) * np.arange(half) / max(half - 1, 1))
        t_rev = np.arange(self.n_timesteps - 1, -1, -1, dtype=np.float64)[:, None]
        ang = t_rev * freqs[None, :]
        emb = np.concatenate([np.sin(ang), np.cos(ang)], axis=1)
        if emb.shape[1] < self.temb_dim:  # odd temb_dim: pad one zero column
            emb = np.pad(emb, ((0, 0), (0, self.temb_dim - emb.shape[1])))
        return emb.astype(np.float32)

    def _sample_impl(self, condition, key):
        batch = condition.shape[0]
        shape = (batch, self.data_dim)

        k0, k1 = jax.random.split(key)
        x0 = jax.random.normal(k0, shape, dtype=jnp.float32) * self.temperature
        # Raw per-step noise in loop order; temperature / t==0 handled in coefs.
        noise = jax.random.normal(k1, (self.n_timesteps,) + shape, dtype=jnp.float32)

        p = self.params
        # Timestep-invariant + per-step first-layer bias, fused on the host:
        # bias_full[g] = condition @ w1c + b1 + temb[g] @ w1t   -> (N_T, B, H)
        bias1 = condition @ p["w1c"] + p["b1"]
        temb_proj = self.temb_table @ p["w1t"]
        bias_full = bias1[None, :, :] + temb_proj[:, None, :]
        b2_full = jnp.broadcast_to(p["b2"], shape)  # pre-broadcast (B, D)

        w1x = p["w1x"].astype(self.mxu_dtype)
        w2 = p["w2"].astype(self.mxu_dtype)

        return p_sample_loop_call(
            self.coef_flat, x0, noise, bias_full, b2_full, w1x, w2,
            n_timesteps=self.n_timesteps,
            clip_denoised=self.clip_denoised,
            mxu_dtype=self.mxu_dtype,
        )

    def p_sample_loop(self, condition, key):
        x = self._sample_jit(condition, key)
        return Sample(x, None)  # return_chain=False

    def forward(self, condition, key):
        return self.p_sample_loop(condition, key)


# ---------------------------------------------------------------------------
# Main
# ---------------------------------------------------------------------------
if __name__ == "__main__":
    B = 2          # batch
    DATA_DIM = 8   # self.data_dim
    COND_DIM = 4   # condition feature dim
    TEMB_DIM = 4   # sinusoidal time-embedding dim
    HIDDEN = 32    # denoiser MLP hidden width
    N_T = 15       # n_timesteps

    root = jax.random.PRNGKey(0)
    k_cond, k_w1x, k_w1c, k_w1t, k_w2, k_loop = jax.random.split(root, 6)

    # Deterministic synthetic denoiser-model parameters.
    params = {
        "w1x": jax.random.normal(k_w1x, (DATA_DIM, HIDDEN), jnp.float32) * 0.2,
        "w1c": jax.random.normal(k_w1c, (COND_DIM, HIDDEN), jnp.float32) * 0.2,
        "w1t": jax.random.normal(k_w1t, (TEMB_DIM, HIDDEN), jnp.float32) * 0.2,
        "b1": jnp.zeros((1, HIDDEN), jnp.float32),
        "w2": jax.random.normal(k_w2, (HIDDEN, DATA_DIM), jnp.float32) * 0.2,
        "b2": jnp.zeros((1, DATA_DIM), jnp.float32),
    }

    condition = jax.random.normal(k_cond, (B, COND_DIM), jnp.float32)

    diffusion = GaussianDiffusionJAX(
        params,
        data_dim=DATA_DIM,
        cond_dim=COND_DIM,
        temb_dim=TEMB_DIM,
        n_timesteps=N_T,
        temperature=1.0,
        clip_denoised=True,
    )

    out = diffusion.forward(condition, k_loop)
    sample = jax.block_until_ready(out.sample)
    assert sample.shape == (B, DATA_DIM)
    assert bool(jnp.all(jnp.isfinite(sample)))
    if diffusion.clip_denoised:
        assert bool(jnp.all(jnp.abs(sample) <= 1.0 + 1e-6))
    print("KERNEL_OK")
</pallas_src>

<mosaic_0001>
module attributes {stable_mosaic.version = 11 : i64} {
  func.func @_fused_p_sample_kernel(%arg0: memref<75xf32, #tpu.memory_space<smem>>, %arg1: memref<2x8xf32, #tpu.memory_space<vmem>>, %arg2: memref<15x2x8xf32, #tpu.memory_space<vmem>>, %arg3: memref<15x2x32xf32, #tpu.memory_space<vmem>>, %arg4: memref<2x8xf32, #tpu.memory_space<vmem>>, %arg5: memref<8x32xbf16, #tpu.memory_space<vmem>>, %arg6: memref<32x8xbf16, #tpu.memory_space<vmem>>, %arg7: memref<2x8xf32, #tpu.memory_space<vmem>>) attributes {dimension_semantics = [], scalar_prefetch = 0 : i64, scratch_operands = 0 : i64, tpu.core_type = #tpu.core_type<tc>} {
    %c0 = arith.constant 0 : index
    %c0_0 = arith.constant 0 : index
    %0 = vector.load %arg5[%c0, %c0_0] : memref<8x32xbf16, #tpu.memory_space<vmem>>, vector<8x32xbf16>
    %c0_1 = arith.constant 0 : index
    %c0_2 = arith.constant 0 : index
    %1 = vector.load %arg6[%c0_1, %c0_2] : memref<32x8xbf16, #tpu.memory_space<vmem>>, vector<32x8xbf16>
    %c0_3 = arith.constant 0 : index
    %c0_4 = arith.constant 0 : index
    %2 = vector.load %arg4[%c0_3, %c0_4] : memref<2x8xf32, #tpu.memory_space<vmem>>, vector<2x8xf32>
    %c0_5 = arith.constant 0 : index
    %c0_6 = arith.constant 0 : index
    %3 = vector.load %arg1[%c0_5, %c0_6] : memref<2x8xf32, #tpu.memory_space<vmem>>, vector<2x8xf32>
    %c0_i32 = arith.constant 0 : i32
    %c5_i32 = arith.constant 5 : i32
    %4 = arith.muli %c0_i32, %c5_i32 : i32
    %c0_i32_7 = arith.constant 0 : i32
    %5 = arith.addi %4, %c0_i32_7 : i32
    %6 = arith.index_cast %5 : i32 to index
    %7 = memref.load %arg0[%6] : memref<75xf32, #tpu.memory_space<smem>>
    %c1_i32 = arith.constant 1 : i32
    %8 = arith.addi %4, %c1_i32 : i32
    %9 = arith.index_cast %8 : i32 to index
    %10 = memref.load %arg0[%9] : memref<75xf32, #tpu.memory_space<smem>>
    %c2_i32 = arith.constant 2 : i32
    %11 = arith.addi %4, %c2_i32 : i32
    %12 = arith.index_cast %11 : i32 to index
    %13 = memref.load %arg0[%12] : memref<75xf32, #tpu.memory_space<smem>>
    %c3_i32 = arith.constant 3 : i32
    %14 = arith.addi %4, %c3_i32 : i32
    %15 = arith.index_cast %14 : i32 to index
    %16 = memref.load %arg0[%15] : memref<75xf32, #tpu.memory_space<smem>>
    %c4_i32 = arith.constant 4 : i32
    %17 = arith.addi %4, %c4_i32 : i32
    %18 = arith.index_cast %17 : i32 to index
    %19 = memref.load %arg0[%18] : memref<75xf32, #tpu.memory_space<smem>>
    %20 = arith.truncf %3 : vector<2x8xf32> to vector<2x8xbf16>
    %cst = arith.constant dense<0.000000e+00> : vector<2x32xf32>
    %21 = tpu.matmul %20, %0, %cst {dimension_numbers = #tpu.dot_dimension_numbers<[1], [0], [0], [1], [0, 0, 1, 1], [], []>} : vector<2x8xbf16>, vector<8x32xbf16>, vector<2x32xf32> -> vector<2x32xf32>
    %22 = arith.index_cast %c0_i32 : i32 to index
    %c0_8 = arith.constant 0 : index
    %c0_9 = arith.constant 0 : index
    %23 = vector.load %arg3[%22, %c0_8, %c0_9] : memref<15x2x32xf32, #tpu.memory_space<vmem>>, vector<1x2x32xf32>
    %24 = vector.shape_cast %23 : vector<1x2x32xf32> to vector<2x32xf32>
    %25 = arith.addf %21, %24 : vector<2x32xf32>
    %cst_10 = arith.constant 0.000000e+00 : f32
    %26 = vector.broadcast %cst_10 : f32 to vector<2x32xf32>
    %27 = arith.maximumf %25, %26 : vector<2x32xf32>
    %28 = arith.truncf %27 : vector<2x32xf32> to vector<2x32xbf16>
    %cst_11 = arith.constant dense<0.000000e+00> : vector<2x8xf32>
    %29 = tpu.matmul %28, %1, %cst_11 {dimension_numbers = #tpu.dot_dimension_numbers<[1], [0], [0], [1], [0, 0, 1, 1], [], []>} : vector<2x32xbf16>, vector<32x8xbf16>, vector<2x8xf32> -> vector<2x8xf32>
    %30 = arith.addf %29, %2 : vector<2x8xf32>
    %31 = vector.broadcast %7 : f32 to vector<2x8xf32>
    %32 = arith.mulf %31, %3 : vector<2x8xf32>
    %33 = vector.broadcast %10 : f32 to vector<2x8xf32>
    %34 = arith.mulf %33, %30 : vector<2x8xf32>
    %35 = arith.subf %32, %34 : vector<2x8xf32>
    %cst_12 = arith.constant -1.000000e+00 : f32
    %cst_13 = arith.constant 1.000000e+00 : f32
    %36 = vector.broadcast %cst_12 : f32 to vector<2x8xf32>
    %37 = arith.maximumf %36, %35 : vector<2x8xf32>
    %38 = vector.broadcast %cst_13 : f32 to vector<2x8xf32>
    %39 = arith.minimumf %38, %37 : vector<2x8xf32>
    %40 = vector.broadcast %13 : f32 to vector<2x8xf32>
    %41 = arith.mulf %40, %39 : vector<2x8xf32>
    %42 = vector.broadcast %16 : f32 to vector<2x8xf32>
    %43 = arith.mulf %42, %3 : vector<2x8xf32>
    %44 = arith.addf %41, %43 : vector<2x8xf32>
    %45 = arith.index_cast %c0_i32 : i32 to index
    %c0_14 = arith.constant 0 : index
    %c0_15 = arith.constant 0 : index
    %46 = vector.load %arg2[%45, %c0_14, %c0_15] : memref<15x2x8xf32, #tpu.memory_space<vmem>>, vector<1x2x8xf32>
    %47 = vector.shape_cast %46 : vector<1x2x8xf32> to vector<2x8xf32>
    %48 = vector.broadcast %19 : f32 to vector<2x8xf32>
    %49 = arith.mulf %48, %47 : vector<2x8xf32>
    %50 = arith.addf %44, %49 : vector<2x8xf32>
    %c1_i32_16 = arith.constant 1 : i32
    %c5_i32_17 = arith.constant 5 : i32
    %51 = arith.muli %c1_i32_16, %c5_i32_17 : i32
    %c0_i32_18 = arith.constant 0 : i32
    %52 = arith.addi %51, %c0_i32_18 : i32
    %53 = arith.index_cast %52 : i32 to index
    %54 = memref.load %arg0[%53] : memref<75xf32, #tpu.memory_space<smem>>
    %c1_i32_19 = arith.constant 1 : i32
    %55 = arith.addi %51, %c1_i32_19 : i32
    %56 = arith.index_cast %55 : i32 to index
    %57 = memref.load %arg0[%56] : memref<75xf32, #tpu.memory_space<smem>>
    %c2_i32_20 = arith.constant 2 : i32
    %58 = arith.addi %51, %c2_i32_20 : i32
    %59 = arith.index_cast %58 : i32 to index
    %60 = memref.load %arg0[%59] : memref<75xf32, #tpu.memory_space<smem>>
    %c3_i32_21 = arith.constant 3 : i32
    %61 = arith.addi %51, %c3_i32_21 : i32
    %62 = arith.index_cast %61 : i32 to index
    %63 = memref.load %arg0[%62] : memref<75xf32, #tpu.memory_space<smem>>
    %c4_i32_22 = arith.constant 4 : i32
    %64 = arith.addi %51, %c4_i32_22 : i32
    %65 = arith.index_cast %64 : i32 to index
    %66 = memref.load %arg0[%65] : memref<75xf32, #tpu.memory_space<smem>>
    %67 = arith.truncf %50 : vector<2x8xf32> to vector<2x8xbf16>
    %cst_23 = arith.constant dense<0.000000e+00> : vector<2x32xf32>
    %68 = tpu.matmul %67, %0, %cst_23 {dimension_numbers = #tpu.dot_dimension_numbers<[1], [0], [0], [1], [0, 0, 1, 1], [], []>} : vector<2x8xbf16>, vector<8x32xbf16>, vector<2x32xf32> -> vector<2x32xf32>
    %69 = arith.index_cast %c1_i32_16 : i32 to index
    %c0_24 = arith.constant 0 : index
    %c0_25 = arith.constant 0 : index
    %70 = vector.load %arg3[%69, %c0_24, %c0_25] : memref<15x2x32xf32, #tpu.memory_space<vmem>>, vector<1x2x32xf32>
    %71 = vector.shape_cast %70 : vector<1x2x32xf32> to vector<2x32xf32>
    %72 = arith.addf %68, %71 : vector<2x32xf32>
    %cst_26 = arith.constant 0.000000e+00 : f32
    %73 = vector.broadcast %cst_26 : f32 to vector<2x32xf32>
    %74 = arith.maximumf %72, %73 : vector<2x32xf32>
    %75 = arith.truncf %74 : vector<2x32xf32> to vector<2x32xbf16>
    %cst_27 = arith.constant dense<0.000000e+00> : vector<2x8xf32>
    %76 = tpu.matmul %75, %1, %cst_27 {dimension_numbers = #tpu.dot_dimension_numbers<[1], [0], [0], [1], [0, 0, 1, 1], [], []>} : vector<2x32xbf16>, vector<32x8xbf16>, vector<2x8xf32> -> vector<2x8xf32>
    %77 = arith.addf %76, %2 : vector<2x8xf32>
    %78 = vector.broadcast %54 : f32 to vector<2x8xf32>
    %79 = arith.mulf %78, %50 : vector<2x8xf32>
    %80 = vector.broadcast %57 : f32 to vector<2x8xf32>
    %81 = arith.mulf %80, %77 : vector<2x8xf32>
    %82 = arith.subf %79, %81 : vector<2x8xf32>
    %cst_28 = arith.constant -1.000000e+00 : f32
    %cst_29 = arith.constant 1.000000e+00 : f32
    %83 = vector.broadcast %cst_28 : f32 to vector<2x8xf32>
    %84 = arith.maximumf %83, %82 : vector<2x8xf32>
    %85 = vector.broadcast %cst_29 : f32 to vector<2x8xf32>
    %86 = arith.minimumf %85, %84 : vector<2x8xf32>
    %87 = vector.broadcast %60 : f32 to vector<2x8xf32>
    %88 = arith.mulf %87, %86 : vector<2x8xf32>
    %89 = vector.broadcast %63 : f32 to vector<2x8xf32>
    %90 = arith.mulf %89, %50 : vector<2x8xf32>
    %91 = arith.addf %88, %90 : vector<2x8xf32>
    %92 = arith.index_cast %c1_i32_16 : i32 to index
    %c0_30 = arith.constant 0 : index
    %c0_31 = arith.constant 0 : index
    %93 = vector.load %arg2[%92, %c0_30, %c0_31] : memref<15x2x8xf32, #tpu.memory_space<vmem>>, vector<1x2x8xf32>
    %94 = vector.shape_cast %93 : vector<1x2x8xf32> to vector<2x8xf32>
    %95 = vector.broadcast %66 : f32 to vector<2x8xf32>
    %96 = arith.mulf %95, %94 : vector<2x8xf32>
    %97 = arith.addf %91, %96 : vector<2x8xf32>
    %c2_i32_32 = arith.constant 2 : i32
    %c5_i32_33 = arith.constant 5 : i32
    %98 = arith.muli %c2_i32_32, %c5_i32_33 : i32
    %c0_i32_34 = arith.constant 0 : i32
    %99 = arith.addi %98, %c0_i32_34 : i32
    %100 = arith.index_cast %99 : i32 to index
    %101 = memref.load %arg0[%100] : memref<75xf32, #tpu.memory_space<smem>>
    %c1_i32_35 = arith.constant 1 : i32
    %102 = arith.addi %98, %c1_i32_35 : i32
    %103 = arith.index_cast %102 : i32 to index
    %104 = memref.load %arg0[%103] : memref<75xf32, #tpu.memory_space<smem>>
    %c2_i32_36 = arith.constant 2 : i32
    %105 = arith.addi %98, %c2_i32_36 : i32
    %106 = arith.index_cast %105 : i32 to index
    %107 = memref.load %arg0[%106] : memref<75xf32, #tpu.memory_space<smem>>
    %c3_i32_37 = arith.constant 3 : i32
    %108 = arith.addi %98, %c3_i32_37 : i32
    %109 = arith.index_cast %108 : i32 to index
    %110 = memref.load %arg0[%109] : memref<75xf32, #tpu.memory_space<smem>>
    %c4_i32_38 = arith.constant 4 : i32
    %111 = arith.addi %98, %c4_i32_38 : i32
    %112 = arith.index_cast %111 : i32 to index
    %113 = memref.load %arg0[%112] : memref<75xf32, #tpu.memory_space<smem>>
    %114 = arith.truncf %97 : vector<2x8xf32> to vector<2x8xbf16>
    %cst_39 = arith.constant dense<0.000000e+00> : vector<2x32xf32>
    %115 = tpu.matmul %114, %0, %cst_39 {dimension_numbers = #tpu.dot_dimension_numbers<[1], [0], [0], [1], [0, 0, 1, 1], [], []>} : vector<2x8xbf16>, vector<8x32xbf16>, vector<2x32xf32> -> vector<2x32xf32>
    %116 = arith.index_cast %c2_i32_32 : i32 to index
    %c0_40 = arith.constant 0 : index
    %c0_41 = arith.constant 0 : index
    %117 = vector.load %arg3[%116, %c0_40, %c0_41] : memref<15x2x32xf32, #tpu.memory_space<vmem>>, vector<1x2x32xf32>
    %118 = vector.shape_cast %117 : vector<1x2x32xf32> to vector<2x32xf32>
    %119 = arith.addf %115, %118 : vector<2x32xf32>
    %cst_42 = arith.constant 0.000000e+00 : f32
    %120 = vector.broadcast %cst_42 : f32 to vector<2x32xf32>
    %121 = arith.maximumf %119, %120 : vector<2x32xf32>
    %122 = arith.truncf %121 : vector<2x32xf32> to vector<2x32xbf16>
    %cst_43 = arith.constant dense<0.000000e+00> : vector<2x8xf32>
    %123 = tpu.matmul %122, %1, %cst_43 {dimension_numbers = #tpu.dot_dimension_numbers<[1], [0], [0], [1], [0, 0, 1, 1], [], []>} : vector<2x32xbf16>, vector<32x8xbf16>, vector<2x8xf32> -> vector<2x8xf32>
    %124 = arith.addf %123, %2 : vector<2x8xf32>
    %125 = vector.broadcast %101 : f32 to vector<2x8xf32>
    %126 = arith.mulf %125, %97 : vector<2x8xf32>
    %127 = vector.broadcast %104 : f32 to vector<2x8xf32>
    %128 = arith.mulf %127, %124 : vector<2x8xf32>
    %129 = arith.subf %126, %128 : vector<2x8xf32>
    %cst_44 = arith.constant -1.000000e+00 : f32
    %cst_45 = arith.constant 1.000000e+00 : f32
    %130 = vector.broadcast %cst_44 : f32 to vector<2x8xf32>
    %131 = arith.maximumf %130, %129 : vector<2x8xf32>
    %132 = vector.broadcast %cst_45 : f32 to vector<2x8xf32>
    %133 = arith.minimumf %132, %131 : vector<2x8xf32>
    %134 = vector.broadcast %107 : f32 to vector<2x8xf32>
    %135 = arith.mulf %134, %133 : vector<2x8xf32>
    %136 = vector.broadcast %110 : f32 to vector<2x8xf32>
    %137 = arith.mulf %136, %97 : vector<2x8xf32>
    %138 = arith.addf %135, %137 : vector<2x8xf32>
    %139 = arith.index_cast %c2_i32_32 : i32 to index
    %c0_46 = arith.constant 0 : index
    %c0_47 = arith.constant 0 : index
    %140 = vector.load %arg2[%139, %c0_46, %c0_47] : memref<15x2x8xf32, #tpu.memory_space<vmem>>, vector<1x2x8xf32>
    %141 = vector.shape_cast %140 : vector<1x2x8xf32> to vector<2x8xf32>
    %142 = vector.broadcast %113 : f32 to vector<2x8xf32>
    %143 = arith.mulf %142, %141 : vector<2x8xf32>
    %144 = arith.addf %138, %143 : vector<2x8xf32>
    %c3_i32_48 = arith.constant 3 : i32
    %c5_i32_49 = arith.constant 5 : i32
    %145 = arith.muli %c3_i32_48, %c5_i32_49 : i32
    %c0_i32_50 = arith.constant 0 : i32
    %146 = arith.addi %145, %c0_i32_50 : i32
    %147 = arith.index_cast %146 : i32 to index
    %148 = memref.load %arg0[%147] : memref<75xf32, #tpu.memory_space<smem>>
    %c1_i32_51 = arith.constant 1 : i32
    %149 = arith.addi %145, %c1_i32_51 : i32
    %150 = arith.index_cast %149 : i32 to index
    %151 = memref.load %arg0[%150] : memref<75xf32, #tpu.memory_space<smem>>
    %c2_i32_52 = arith.constant 2 : i32
    %152 = arith.addi %145, %c2_i32_52 : i32
    %153 = arith.index_cast %152 : i32 to index
    %154 = memref.load %arg0[%153] : memref<75xf32, #tpu.memory_space<smem>>
    %c3_i32_53 = arith.constant 3 : i32
    %155 = arith.addi %145, %c3_i32_53 : i32
    %156 = arith.index_cast %155 : i32 to index
    %157 = memref.load %arg0[%156] : memref<75xf32, #tpu.memory_space<smem>>
    %c4_i32_54 = arith.constant 4 : i32
    %158 = arith.addi %145, %c4_i32_54 : i32
    %159 = arith.index_cast %158 : i32 to index
    %160 = memref.load %arg0[%159] : memref<75xf32, #tpu.memory_space<smem>>
    %161 = arith.truncf %144 : vector<2x8xf32> to vector<2x8xbf16>
    %cst_55 = arith.constant dense<0.000000e+00> : vector<2x32xf32>
    %162 = tpu.matmul %161, %0, %cst_55 {dimension_numbers = #tpu.dot_dimension_numbers<[1], [0], [0], [1], [0, 0, 1, 1], [], []>} : vector<2x8xbf16>, vector<8x32xbf16>, vector<2x32xf32> -> vector<2x32xf32>
    %163 = arith.index_cast %c3_i32_48 : i32 to index
    %c0_56 = arith.constant 0 : index
    %c0_57 = arith.constant 0 : index
    %164 = vector.load %arg3[%163, %c0_56, %c0_57] : memref<15x2x32xf32, #tpu.memory_space<vmem>>, vector<1x2x32xf32>
    %165 = vector.shape_cast %164 : vector<1x2x32xf32> to vector<2x32xf32>
    %166 = arith.addf %162, %165 : vector<2x32xf32>
    %cst_58 = arith.constant 0.000000e+00 : f32
    %167 = vector.broadcast %cst_58 : f32 to vector<2x32xf32>
    %168 = arith.maximumf %166, %167 : vector<2x32xf32>
    %169 = arith.truncf %168 : vector<2x32xf32> to vector<2x32xbf16>
    %cst_59 = arith.constant dense<0.000000e+00> : vector<2x8xf32>
    %170 = tpu.matmul %169, %1, %cst_59 {dimension_numbers = #tpu.dot_dimension_numbers<[1], [0], [0], [1], [0, 0, 1, 1], [], []>} : vector<2x32xbf16>, vector<32x8xbf16>, vector<2x8xf32> -> vector<2x8xf32>
    %171 = arith.addf %170, %2 : vector<2x8xf32>
    %172 = vector.broadcast %148 : f32 to vector<2x8xf32>
    %173 = arith.mulf %172, %144 : vector<2x8xf32>
    %174 = vector.broadcast %151 : f32 to vector<2x8xf32>
    %175 = arith.mulf %174, %171 : vector<2x8xf32>
    %176 = arith.subf %173, %175 : vector<2x8xf32>
    %cst_60 = arith.constant -1.000000e+00 : f32
    %cst_61 = arith.constant 1.000000e+00 : f32
    %177 = vector.broadcast %cst_60 : f32 to vector<2x8xf32>
    %178 = arith.maximumf %177, %176 : vector<2x8xf32>
    %179 = vector.broadcast %cst_61 : f32 to vector<2x8xf32>
    %180 = arith.minimumf %179, %178 : vector<2x8xf32>
    %181 = vector.broadcast %154 : f32 to vector<2x8xf32>
    %182 = arith.mulf %181, %180 : vector<2x8xf32>
    %183 = vector.broadcast %157 : f32 to vector<2x8xf32>
    %184 = arith.mulf %183, %144 : vector<2x8xf32>
    %185 = arith.addf %182, %184 : vector<2x8xf32>
    %186 = arith.index_cast %c3_i32_48 : i32 to index
    %c0_62 = arith.constant 0 : index
    %c0_63 = arith.constant 0 : index
    %187 = vector.load %arg2[%186, %c0_62, %c0_63] : memref<15x2x8xf32, #tpu.memory_space<vmem>>, vector<1x2x8xf32>
    %188 = vector.shape_cast %187 : vector<1x2x8xf32> to vector<2x8xf32>
    %189 = vector.broadcast %160 : f32 to vector<2x8xf32>
    %190 = arith.mulf %189, %188 : vector<2x8xf32>
    %191 = arith.addf %185, %190 : vector<2x8xf32>
    %c4_i32_64 = arith.constant 4 : i32
    %c5_i32_65 = arith.constant 5 : i32
    %192 = arith.muli %c4_i32_64, %c5_i32_65 : i32
    %c0_i32_66 = arith.constant 0 : i32
    %193 = arith.addi %192, %c0_i32_66 : i32
    %194 = arith.index_cast %193 : i32 to index
    %195 = memref.load %arg0[%194] : memref<75xf32, #tpu.memory_space<smem>>
    %c1_i32_67 = arith.constant 1 : i32
    %196 = arith.addi %192, %c1_i32_67 : i32
    %197 = arith.index_cast %196 : i32 to index
    %198 = memref.load %arg0[%197] : memref<75xf32, #tpu.memory_space<smem>>
    %c2_i32_68 = arith.constant 2 : i32
    %199 = arith.addi %192, %c2_i32_68 : i32
    %200 = arith.index_cast %199 : i32 to index
    %201 = memref.load %arg0[%200] : memref<75xf32, #tpu.memory_space<smem>>
    %c3_i32_69 = arith.constant 3 : i32
    %202 = arith.addi %192, %c3_i32_69 : i32
    %203 = arith.index_cast %202 : i32 to index
    %204 = memref.load %arg0[%203] : memref<75xf32, #tpu.memory_space<smem>>
    %c4_i32_70 = arith.constant 4 : i32
    %205 = arith.addi %192, %c4_i32_70 : i32
    %206 = arith.index_cast %205 : i32 to index
    %207 = memref.load %arg0[%206] : memref<75xf32, #tpu.memory_space<smem>>
    %208 = arith.truncf %191 : vector<2x8xf32> to vector<2x8xbf16>
    %cst_71 = arith.constant dense<0.000000e+00> : vector<2x32xf32>
    %209 = tpu.matmul %208, %0, %cst_71 {dimension_numbers = #tpu.dot_dimension_numbers<[1], [0], [0], [1], [0, 0, 1, 1], [], []>} : vector<2x8xbf16>, vector<8x32xbf16>, vector<2x32xf32> -> vector<2x32xf32>
    %210 = arith.index_cast %c4_i32_64 : i32 to index
    %c0_72 = arith.constant 0 : index
    %c0_73 = arith.constant 0 : index
    %211 = vector.load %arg3[%210, %c0_72, %c0_73] : memref<15x2x32xf32, #tpu.memory_space<vmem>>, vector<1x2x32xf32>
    %212 = vector.shape_cast %211 : vector<1x2x32xf32> to vector<2x32xf32>
    %213 = arith.addf %209, %212 : vector<2x32xf32>
    %cst_74 = arith.constant 0.000000e+00 : f32
    %214 = vector.broadcast %cst_74 : f32 to vector<2x32xf32>
    %215 = arith.maximumf %213, %214 : vector<2x32xf32>
    %216 = arith.truncf %215 : vector<2x32xf32> to vector<2x32xbf16>
    %cst_75 = arith.constant dense<0.000000e+00> : vector<2x8xf32>
    %217 = tpu.matmul %216, %1, %cst_75 {dimension_numbers = #tpu.dot_dimension_numbers<[1], [0], [0], [1], [0, 0, 1, 1], [], []>} : vector<2x32xbf16>, vector<32x8xbf16>, vector<2x8xf32> -> vector<2x8xf32>
    %218 = arith.addf %217, %2 : vector<2x8xf32>
    %219 = vector.broadcast %195 : f32 to vector<2x8xf32>
    %220 = arith.mulf %219, %191 : vector<2x8xf32>
    %221 = vector.broadcast %198 : f32 to vector<2x8xf32>
    %222 = arith.mulf %221, %218 : vector<2x8xf32>
    %223 = arith.subf %220, %222 : vector<2x8xf32>
    %cst_76 = arith.constant -1.000000e+00 : f32
    %cst_77 = arith.constant 1.000000e+00 : f32
    %224 = vector.broadcast %cst_76 : f32 to vector<2x8xf32>
    %225 = arith.maximumf %224, %223 : vector<2x8xf32>
    %226 = vector.broadcast %cst_77 : f32 to vector<2x8xf32>
    %227 = arith.minimumf %226, %225 : vector<2x8xf32>
    %228 = vector.broadcast %201 : f32 to vector<2x8xf32>
    %229 = arith.mulf %228, %227 : vector<2x8xf32>
    %230 = vector.broadcast %204 : f32 to vector<2x8xf32>
    %231 = arith.mulf %230, %191 : vector<2x8xf32>
    %232 = arith.addf %229, %231 : vector<2x8xf32>
    %233 = arith.index_cast %c4_i32_64 : i32 to index
    %c0_78 = arith.constant 0 : index
    %c0_79 = arith.constant 0 : index
    %234 = vector.load %arg2[%233, %c0_78, %c0_79] : memref<15x2x8xf32, #tpu.memory_space<vmem>>, vector<1x2x8xf32>
    %235 = vector.shape_cast %234 : vector<1x2x8xf32> to vector<2x8xf32>
    %236 = vector.broadcast %207 : f32 to vector<2x8xf32>
    %237 = arith.mulf %236, %235 : vector<2x8xf32>
    %238 = arith.addf %232, %237 : vector<2x8xf32>
    %c5_i32_80 = arith.constant 5 : i32
    %c5_i32_81 = arith.constant 5 : i32
    %239 = arith.muli %c5_i32_80, %c5_i32_81 : i32
    %c0_i32_82 = arith.constant 0 : i32
    %240 = arith.addi %239, %c0_i32_82 : i32
    %241 = arith.index_cast %240 : i32 to index
    %242 = memref.load %arg0[%241] : memref<75xf32, #tpu.memory_space<smem>>
    %c1_i32_83 = arith.constant 1 : i32
    %243 = arith.addi %239, %c1_i32_83 : i32
    %244 = arith.index_cast %243 : i32 to index
    %245 = memref.load %arg0[%244] : memref<75xf32, #tpu.memory_space<smem>>
    %c2_i32_84 = arith.constant 2 : i32
    %246 = arith.addi %239, %c2_i32_84 : i32
    %247 = arith.index_cast %246 : i32 to index
    %248 = memref.load %arg0[%247] : memref<75xf32, #tpu.memory_space<smem>>
    %c3_i32_85 = arith.constant 3 : i32
    %249 = arith.addi %239, %c3_i32_85 : i32
    %250 = arith.index_cast %249 : i32 to index
    %251 = memref.load %arg0[%250] : memref<75xf32, #tpu.memory_space<smem>>
    %c4_i32_86 = arith.constant 4 : i32
    %252 = arith.addi %239, %c4_i32_86 : i32
    %253 = arith.index_cast %252 : i32 to index
    %254 = memref.load %arg0[%253] : memref<75xf32, #tpu.memory_space<smem>>
    %255 = arith.truncf %238 : vector<2x8xf32> to vector<2x8xbf16>
    %cst_87 = arith.constant dense<0.000000e+00> : vector<2x32xf32>
    %256 = tpu.matmul %255, %0, %cst_87 {dimension_numbers = #tpu.dot_dimension_numbers<[1], [0], [0], [1], [0, 0, 1, 1], [], []>} : vector<2x8xbf16>, vector<8x32xbf16>, vector<2x32xf32> -> vector<2x32xf32>
    %257 = arith.index_cast %c5_i32_80 : i32 to index
    %c0_88 = arith.constant 0 : index
    %c0_89 = arith.constant 0 : index
    %258 = vector.load %arg3[%257, %c0_88, %c0_89] : memref<15x2x32xf32, #tpu.memory_space<vmem>>, vector<1x2x32xf32>
    %259 = vector.shape_cast %258 : vector<1x2x32xf32> to vector<2x32xf32>
    %260 = arith.addf %256, %259 : vector<2x32xf32>
    %cst_90 = arith.constant 0.000000e+00 : f32
    %261 = vector.broadcast %cst_90 : f32 to vector<2x32xf32>
    %262 = arith.maximumf %260, %261 : vector<2x32xf32>
    %263 = arith.truncf %262 : vector<2x32xf32> to vector<2x32xbf16>
    %cst_91 = arith.constant dense<0.000000e+00> : vector<2x8xf32>
    %264 = tpu.matmul %263, %1, %cst_91 {dimension_numbers = #tpu.dot_dimension_numbers<[1], [0], [0], [1], [0, 0, 1, 1], [], []>} : vector<2x32xbf16>, vector<32x8xbf16>, vector<2x8xf32> -> vector<2x8xf32>
    %265 = arith.addf %264, %2 : vector<2x8xf32>
    %266 = vector.broadcast %242 : f32 to vector<2x8xf32>
    %267 = arith.mulf %266, %238 : vector<2x8xf32>
    %268 = vector.broadcast %245 : f32 to vector<2x8xf32>
    %269 = arith.mulf %268, %265 : vector<2x8xf32>
    %270 = arith.subf %267, %269 : vector<2x8xf32>
    %cst_92 = arith.constant -1.000000e+00 : f32
    %cst_93 = arith.constant 1.000000e+00 : f32
    %271 = vector.broadcast %cst_92 : f32 to vector<2x8xf32>
    %272 = arith.maximumf %271, %270 : vector<2x8xf32>
    %273 = vector.broadcast %cst_93 : f32 to vector<2x8xf32>
    %274 = arith.minimumf %273, %272 : vector<2x8xf32>
    %275 = vector.broadcast %248 : f32 to vector<2x8xf32>
    %276 = arith.mulf %275, %274 : vector<2x8xf32>
    %277 = vector.broadcast %251 : f32 to vector<2x8xf32>
    %278 = arith.mulf %277, %238 : vector<2x8xf32>
    %279 = arith.addf %276, %278 : vector<2x8xf32>
    %280 = arith.index_cast %c5_i32_80 : i32 to index
    %c0_94 = arith.constant 0 : index
    %c0_95 = arith.constant 0 : index
    %281 = vector.load %arg2[%280, %c0_94, %c0_95] : memref<15x2x8xf32, #tpu.memory_space<vmem>>, vector<1x2x8xf32>
    %282 = vector.shape_cast %281 : vector<1x2x8xf32> to vector<2x8xf32>
    %283 = vector.broadcast %254 : f32 to vector<2x8xf32>
    %284 = arith.mulf %283, %282 : vector<2x8xf32>
    %285 = arith.addf %279, %284 : vector<2x8xf32>
    %c6_i32 = arith.constant 6 : i32
    %c5_i32_96 = arith.constant 5 : i32
    %286 = arith.muli %c6_i32, %c5_i32_96 : i32
    %c0_i32_97 = arith.constant 0 : i32
    %287 = arith.addi %286, %c0_i32_97 : i32
    %288 = arith.index_cast %287 : i32 to index
    %289 = memref.load %arg0[%288] : memref<75xf32, #tpu.memory_space<smem>>
    %c1_i32_98 = arith.constant 1 : i32
    %290 = arith.addi %286, %c1_i32_98 : i32
    %291 = arith.index_cast %290 : i32 to index
    %292 = memref.load %arg0[%291] : memref<75xf32, #tpu.memory_space<smem>>
    %c2_i32_99 = arith.constant 2 : i32
    %293 = arith.addi %286, %c2_i32_99 : i32
    %294 = arith.index_cast %293 : i32 to index
    %295 = memref.load %arg0[%294] : memref<75xf32, #tpu.memory_space<smem>>
    %c3_i32_100 = arith.constant 3 : i32
    %296 = arith.addi %286, %c3_i32_100 : i32
    %297 = arith.index_cast %296 : i32 to index
    %298 = memref.load %arg0[%297] : memref<75xf32, #tpu.memory_space<smem>>
    %c4_i32_101 = arith.constant 4 : i32
    %299 = arith.addi %286, %c4_i32_101 : i32
    %300 = arith.index_cast %299 : i32 to index
    %301 = memref.load %arg0[%300] : memref<75xf32, #tpu.memory_space<smem>>
    %302 = arith.truncf %285 : vector<2x8xf32> to vector<2x8xbf16>
    %cst_102 = arith.constant dense<0.000000e+00> : vector<2x32xf32>
    %303 = tpu.matmul %302, %0, %cst_102 {dimension_numbers = #tpu.dot_dimension_numbers<[1], [0], [0], [1], [0, 0, 1, 1], [], []>} : vector<2x8xbf16>, vector<8x32xbf16>, vector<2x32xf32> -> vector<2x32xf32>
    %304 = arith.index_cast %c6_i32 : i32 to index
    %c0_103 = arith.constant 0 : index
    %c0_104 = arith.constant 0 : index
    %305 = vector.load %arg3[%304, %c0_103, %c0_104] : memref<15x2x32xf32, #tpu.memory_space<vmem>>, vector<1x2x32xf32>
    %306 = vector.shape_cast %305 : vector<1x2x32xf32> to vector<2x32xf32>
    %307 = arith.addf %303, %306 : vector<2x32xf32>
    %cst_105 = arith.constant 0.000000e+00 : f32
    %308 = vector.broadcast %cst_105 : f32 to vector<2x32xf32>
    %309 = arith.maximumf %307, %308 : vector<2x32xf32>
    %310 = arith.truncf %309 : vector<2x32xf32> to vector<2x32xbf16>
    %cst_106 = arith.constant dense<0.000000e+00> : vector<2x8xf32>
    %311 = tpu.matmul %310, %1, %cst_106 {dimension_numbers = #tpu.dot_dimension_numbers<[1], [0], [0], [1], [0, 0, 1, 1], [], []>} : vector<2x32xbf16>, vector<32x8xbf16>, vector<2x8xf32> -> vector<2x8xf32>
    %312 = arith.addf %311, %2 : vector<2x8xf32>
    %313 = vector.broadcast %289 : f32 to vector<2x8xf32>
    %314 = arith.mulf %313, %285 : vector<2x8xf32>
    %315 = vector.broadcast %292 : f32 to vector<2x8xf32>
    %316 = arith.mulf %315, %312 : vector<2x8xf32>
    %317 = arith.subf %314, %316 : vector<2x8xf32>
    %cst_107 = arith.constant -1.000000e+00 : f32
    %cst_108 = arith.constant 1.000000e+00 : f32
    %318 = vector.broadcast %cst_107 : f32 to vector<2x8xf32>
    %319 = arith.maximumf %318, %317 : vector<2x8xf32>
    %320 = vector.broadcast %cst_108 : f32 to vector<2x8xf32>
    %321 = arith.minimumf %320, %319 : vector<2x8xf32>
    %322 = vector.broadcast %295 : f32 to vector<2x8xf32>
    %323 = arith.mulf %322, %321 : vector<2x8xf32>
    %324 = vector.broadcast %298 : f32 to vector<2x8xf32>
    %325 = arith.mulf %324, %285 : vector<2x8xf32>
    %326 = arith.addf %323, %325 : vector<2x8xf32>
    %327 = arith.index_cast %c6_i32 : i32 to index
    %c0_109 = arith.constant 0 : index
    %c0_110 = arith.constant 0 : index
    %328 = vector.load %arg2[%327, %c0_109, %c0_110] : memref<15x2x8xf32, #tpu.memory_space<vmem>>, vector<1x2x8xf32>
    %329 = vector.shape_cast %328 : vector<1x2x8xf32> to vector<2x8xf32>
    %330 = vector.broadcast %301 : f32 to vector<2x8xf32>
    %331 = arith.mulf %330, %329 : vector<2x8xf32>
    %332 = arith.addf %326, %331 : vector<2x8xf32>
    %c7_i32 = arith.constant 7 : i32
    %c5_i32_111 = arith.constant 5 : i32
    %333 = arith.muli %c7_i32, %c5_i32_111 : i32
    %c0_i32_112 = arith.constant 0 : i32
    %334 = arith.addi %333, %c0_i32_112 : i32
    %335 = arith.index_cast %334 : i32 to index
    %336 = memref.load %arg0[%335] : memref<75xf32, #tpu.memory_space<smem>>
    %c1_i32_113 = arith.constant 1 : i32
    %337 = arith.addi %333, %c1_i32_113 : i32
    %338 = arith.index_cast %337 : i32 to index
    %339 = memref.load %arg0[%338] : memref<75xf32, #tpu.memory_space<smem>>
    %c2_i32_114 = arith.constant 2 : i32
    %340 = arith.addi %333, %c2_i32_114 : i32
    %341 = arith.index_cast %340 : i32 to index
    %342 = memref.load %arg0[%341] : memref<75xf32, #tpu.memory_space<smem>>
    %c3_i32_115 = arith.constant 3 : i32
    %343 = arith.addi %333, %c3_i32_115 : i32
    %344 = arith.index_cast %343 : i32 to index
    %345 = memref.load %arg0[%344] : memref<75xf32, #tpu.memory_space<smem>>
    %c4_i32_116 = arith.constant 4 : i32
    %346 = arith.addi %333, %c4_i32_116 : i32
    %347 = arith.index_cast %346 : i32 to index
    %348 = memref.load %arg0[%347] : memref<75xf32, #tpu.memory_space<smem>>
    %349 = arith.truncf %332 : vector<2x8xf32> to vector<2x8xbf16>
    %cst_117 = arith.constant dense<0.000000e+00> : vector<2x32xf32>
    %350 = tpu.matmul %349, %0, %cst_117 {dimension_numbers = #tpu.dot_dimension_numbers<[1], [0], [0], [1], [0, 0, 1, 1], [], []>} : vector<2x8xbf16>, vector<8x32xbf16>, vector<2x32xf32> -> vector<2x32xf32>
    %351 = arith.index_cast %c7_i32 : i32 to index
    %c0_118 = arith.constant 0 : index
    %c0_119 = arith.constant 0 : index
    %352 = vector.load %arg3[%351, %c0_118, %c0_119] : memref<15x2x32xf32, #tpu.memory_space<vmem>>, vector<1x2x32xf32>
    %353 = vector.shape_cast %352 : vector<1x2x32xf32> to vector<2x32xf32>
    %354 = arith.addf %350, %353 : vector<2x32xf32>
    %cst_120 = arith.constant 0.000000e+00 : f32
    %355 = vector.broadcast %cst_120 : f32 to vector<2x32xf32>
    %356 = arith.maximumf %354, %355 : vector<2x32xf32>
    %357 = arith.truncf %356 : vector<2x32xf32> to vector<2x32xbf16>
    %cst_121 = arith.constant dense<0.000000e+00> : vector<2x8xf32>
    %358 = tpu.matmul %357, %1, %cst_121 {dimension_numbers = #tpu.dot_dimension_numbers<[1], [0], [0], [1], [0, 0, 1, 1], [], []>} : vector<2x32xbf16>, vector<32x8xbf16>, vector<2x8xf32> -> vector<2x8xf32>
    %359 = arith.addf %358, %2 : vector<2x8xf32>
    %360 = vector.broadcast %336 : f32 to vector<2x8xf32>
    %361 = arith.mulf %360, %332 : vector<2x8xf32>
    %362 = vector.broadcast %339 : f32 to vector<2x8xf32>
    %363 = arith.mulf %362, %359 : vector<2x8xf32>
    %364 = arith.subf %361, %363 : vector<2x8xf32>
    %cst_122 = arith.constant -1.000000e+00 : f32
    %cst_123 = arith.constant 1.000000e+00 : f32
    %365 = vector.broadcast %cst_122 : f32 to vector<2x8xf32>
    %366 = arith.maximumf %365, %364 : vector<2x8xf32>
    %367 = vector.broadcast %cst_123 : f32 to vector<2x8xf32>
    %368 = arith.minimumf %367, %366 : vector<2x8xf32>
    %369 = vector.broadcast %342 : f32 to vector<2x8xf32>
    %370 = arith.mulf %369, %368 : vector<2x8xf32>
    %371 = vector.broadcast %345 : f32 to vector<2x8xf32>
    %372 = arith.mulf %371, %332 : vector<2x8xf32>
    %373 = arith.addf %370, %372 : vector<2x8xf32>
    %374 = arith.index_cast %c7_i32 : i32 to index
    %c0_124 = arith.constant 0 : index
    %c0_125 = arith.constant 0 : index
    %375 = vector.load %arg2[%374, %c0_124, %c0_125] : memref<15x2x8xf32, #tpu.memory_space<vmem>>, vector<1x2x8xf32>
    %376 = vector.shape_cast %375 : vector<1x2x8xf32> to vector<2x8xf32>
    %377 = vector.broadcast %348 : f32 to vector<2x8xf32>
    %378 = arith.mulf %377, %376 : vector<2x8xf32>
    %379 = arith.addf %373, %378 : vector<2x8xf32>
    %c8_i32 = arith.constant 8 : i32
    %c5_i32_126 = arith.constant 5 : i32
    %380 = arith.muli %c8_i32, %c5_i32_126 : i32
    %c0_i32_127 = arith.constant 0 : i32
    %381 = arith.addi %380, %c0_i32_127 : i32
    %382 = arith.index_cast %381 : i32 to index
    %383 = memref.load %arg0[%382] : memref<75xf32, #tpu.memory_space<smem>>
    %c1_i32_128 = arith.constant 1 : i32
    %384 = arith.addi %380, %c1_i32_128 : i32
    %385 = arith.index_cast %384 : i32 to index
    %386 = memref.load %arg0[%385] : memref<75xf32, #tpu.memory_space<smem>>
    %c2_i32_129 = arith.constant 2 : i32
    %387 = arith.addi %380, %c2_i32_129 : i32
    %388 = arith.index_cast %387 : i32 to index
    %389 = memref.load %arg0[%388] : memref<75xf32, #tpu.memory_space<smem>>
    %c3_i32_130 = arith.constant 3 : i32
    %390 = arith.addi %380, %c3_i32_130 : i32
    %391 = arith.index_cast %390 : i32 to index
    %392 = memref.load %arg0[%391] : memref<75xf32, #tpu.memory_space<smem>>
    %c4_i32_131 = arith.constant 4 : i32
    %393 = arith.addi %380, %c4_i32_131 : i32
    %394 = arith.index_cast %393 : i32 to index
    %395 = memref.load %arg0[%394] : memref<75xf32, #tpu.memory_space<smem>>
    %396 = arith.truncf %379 : vector<2x8xf32> to vector<2x8xbf16>
    %cst_132 = arith.constant dense<0.000000e+00> : vector<2x32xf32>
    %397 = tpu.matmul %396, %0, %cst_132 {dimension_numbers = #tpu.dot_dimension_numbers<[1], [0], [0], [1], [0, 0, 1, 1], [], []>} : vector<2x8xbf16>, vector<8x32xbf16>, vector<2x32xf32> -> vector<2x32xf32>
    %398 = arith.index_cast %c8_i32 : i32 to index
    %c0_133 = arith.constant 0 : index
    %c0_134 = arith.constant 0 : index
    %399 = vector.load %arg3[%398, %c0_133, %c0_134] : memref<15x2x32xf32, #tpu.memory_space<vmem>>, vector<1x2x32xf32>
    %400 = vector.shape_cast %399 : vector<1x2x32xf32> to vector<2x32xf32>
    %401 = arith.addf %397, %400 : vector<2x32xf32>
    %cst_135 = arith.constant 0.000000e+00 : f32
    %402 = vector.broadcast %cst_135 : f32 to vector<2x32xf32>
    %403 = arith.maximumf %401, %402 : vector<2x32xf32>
    %404 = arith.truncf %403 : vector<2x32xf32> to vector<2x32xbf16>
    %cst_136 = arith.constant dense<0.000000e+00> : vector<2x8xf32>
    %405 = tpu.matmul %404, %1, %cst_136 {dimension_numbers = #tpu.dot_dimension_numbers<[1], [0], [0], [1], [0, 0, 1, 1], [], []>} : vector<2x32xbf16>, vector<32x8xbf16>, vector<2x8xf32> -> vector<2x8xf32>
    %406 = arith.addf %405, %2 : vector<2x8xf32>
    %407 = vector.broadcast %383 : f32 to vector<2x8xf32>
    %408 = arith.mulf %407, %379 : vector<2x8xf32>
    %409 = vector.broadcast %386 : f32 to vector<2x8xf32>
    %410 = arith.mulf %409, %406 : vector<2x8xf32>
    %411 = arith.subf %408, %410 : vector<2x8xf32>
    %cst_137 = arith.constant -1.000000e+00 : f32
    %cst_138 = arith.constant 1.000000e+00 : f32
    %412 = vector.broadcast %cst_137 : f32 to vector<2x8xf32>
    %413 = arith.maximumf %412, %411 : vector<2x8xf32>
    %414 = vector.broadcast %cst_138 : f32 to vector<2x8xf32>
    %415 = arith.minimumf %414, %413 : vector<2x8xf32>
    %416 = vector.broadcast %389 : f32 to vector<2x8xf32>
    %417 = arith.mulf %416, %415 : vector<2x8xf32>
    %418 = vector.broadcast %392 : f32 to vector<2x8xf32>
    %419 = arith.mulf %418, %379 : vector<2x8xf32>
    %420 = arith.addf %417, %419 : vector<2x8xf32>
    %421 = arith.index_cast %c8_i32 : i32 to index
    %c0_139 = arith.constant 0 : index
    %c0_140 = arith.constant 0 : index
    %422 = vector.load %arg2[%421, %c0_139, %c0_140] : memref<15x2x8xf32, #tpu.memory_space<vmem>>, vector<1x2x8xf32>
    %423 = vector.shape_cast %422 : vector<1x2x8xf32> to vector<2x8xf32>
    %424 = vector.broadcast %395 : f32 to vector<2x8xf32>
    %425 = arith.mulf %424, %423 : vector<2x8xf32>
    %426 = arith.addf %420, %425 : vector<2x8xf32>
    %c9_i32 = arith.constant 9 : i32
    %c5_i32_141 = arith.constant 5 : i32
    %427 = arith.muli %c9_i32, %c5_i32_141 : i32
    %c0_i32_142 = arith.constant 0 : i32
    %428 = arith.addi %427, %c0_i32_142 : i32
    %429 = arith.index_cast %428 : i32 to index
    %430 = memref.load %arg0[%429] : memref<75xf32, #tpu.memory_space<smem>>
    %c1_i32_143 = arith.constant 1 : i32
    %431 = arith.addi %427, %c1_i32_143 : i32
    %432 = arith.index_cast %431 : i32 to index
    %433 = memref.load %arg0[%432] : memref<75xf32, #tpu.memory_space<smem>>
    %c2_i32_144 = arith.constant 2 : i32
    %434 = arith.addi %427, %c2_i32_144 : i32
    %435 = arith.index_cast %434 : i32 to index
    %436 = memref.load %arg0[%435] : memref<75xf32, #tpu.memory_space<smem>>
    %c3_i32_145 = arith.constant 3 : i32
    %437 = arith.addi %427, %c3_i32_145 : i32
    %438 = arith.index_cast %437 : i32 to index
    %439 = memref.load %arg0[%438] : memref<75xf32, #tpu.memory_space<smem>>
    %c4_i32_146 = arith.constant 4 : i32
    %440 = arith.addi %427, %c4_i32_146 : i32
    %441 = arith.index_cast %440 : i32 to index
    %442 = memref.load %arg0[%441] : memref<75xf32, #tpu.memory_space<smem>>
    %443 = arith.truncf %426 : vector<2x8xf32> to vector<2x8xbf16>
    %cst_147 = arith.constant dense<0.000000e+00> : vector<2x32xf32>
    %444 = tpu.matmul %443, %0, %cst_147 {dimension_numbers = #tpu.dot_dimension_numbers<[1], [0], [0], [1], [0, 0, 1, 1], [], []>} : vector<2x8xbf16>, vector<8x32xbf16>, vector<2x32xf32> -> vector<2x32xf32>
    %445 = arith.index_cast %c9_i32 : i32 to index
    %c0_148 = arith.constant 0 : index
    %c0_149 = arith.constant 0 : index
    %446 = vector.load %arg3[%445, %c0_148, %c0_149] : memref<15x2x32xf32, #tpu.memory_space<vmem>>, vector<1x2x32xf32>
    %447 = vector.shape_cast %446 : vector<1x2x32xf32> to vector<2x32xf32>
    %448 = arith.addf %444, %447 : vector<2x32xf32>
    %cst_150 = arith.constant 0.000000e+00 : f32
    %449 = vector.broadcast %cst_150 : f32 to vector<2x32xf32>
    %450 = arith.maximumf %448, %449 : vector<2x32xf32>
    %451 = arith.truncf %450 : vector<2x32xf32> to vector<2x32xbf16>
    %cst_151 = arith.constant dense<0.000000e+00> : vector<2x8xf32>
    %452 = tpu.matmul %451, %1, %cst_151 {dimension_numbers = #tpu.dot_dimension_numbers<[1], [0], [0], [1], [0, 0, 1, 1], [], []>} : vector<2x32xbf16>, vector<32x8xbf16>, vector<2x8xf32> -> vector<2x8xf32>
    %453 = arith.addf %452, %2 : vector<2x8xf32>
    %454 = vector.broadcast %430 : f32 to vector<2x8xf32>
    %455 = arith.mulf %454, %426 : vector<2x8xf32>
    %456 = vector.broadcast %433 : f32 to vector<2x8xf32>
    %457 = arith.mulf %456, %453 : vector<2x8xf32>
    %458 = arith.subf %455, %457 : vector<2x8xf32>
    %cst_152 = arith.constant -1.000000e+00 : f32
    %cst_153 = arith.constant 1.000000e+00 : f32
    %459 = vector.broadcast %cst_152 : f32 to vector<2x8xf32>
    %460 = arith.maximumf %459, %458 : vector<2x8xf32>
    %461 = vector.broadcast %cst_153 : f32 to vector<2x8xf32>
    %462 = arith.minimumf %461, %460 : vector<2x8xf32>
    %463 = vector.broadcast %436 : f32 to vector<2x8xf32>
    %464 = arith.mulf %463, %462 : vector<2x8xf32>
    %465 = vector.broadcast %439 : f32 to vector<2x8xf32>
    %466 = arith.mulf %465, %426 : vector<2x8xf32>
    %467 = arith.addf %464, %466 : vector<2x8xf32>
    %468 = arith.index_cast %c9_i32 : i32 to index
    %c0_154 = arith.constant 0 : index
    %c0_155 = arith.constant 0 : index
    %469 = vector.load %arg2[%468, %c0_154, %c0_155] : memref<15x2x8xf32, #tpu.memory_space<vmem>>, vector<1x2x8xf32>
    %470 = vector.shape_cast %469 : vector<1x2x8xf32> to vector<2x8xf32>
    %471 = vector.broadcast %442 : f32 to vector<2x8xf32>
    %472 = arith.mulf %471, %470 : vector<2x8xf32>
    %473 = arith.addf %467, %472 : vector<2x8xf32>
    %c10_i32 = arith.constant 10 : i32
    %c5_i32_156 = arith.constant 5 : i32
    %474 = arith.muli %c10_i32, %c5_i32_156 : i32
    %c0_i32_157 = arith.constant 0 : i32
    %475 = arith.addi %474, %c0_i32_157 : i32
    %476 = arith.index_cast %475 : i32 to index
    %477 = memref.load %arg0[%476] : memref<75xf32, #tpu.memory_space<smem>>
    %c1_i32_158 = arith.constant 1 : i32
    %478 = arith.addi %474, %c1_i32_158 : i32
    %479 = arith.index_cast %478 : i32 to index
    %480 = memref.load %arg0[%479] : memref<75xf32, #tpu.memory_space<smem>>
    %c2_i32_159 = arith.constant 2 : i32
    %481 = arith.addi %474, %c2_i32_159 : i32
    %482 = arith.index_cast %481 : i32 to index
    %483 = memref.load %arg0[%482] : memref<75xf32, #tpu.memory_space<smem>>
    %c3_i32_160 = arith.constant 3 : i32
    %484 = arith.addi %474, %c3_i32_160 : i32
    %485 = arith.index_cast %484 : i32 to index
    %486 = memref.load %arg0[%485] : memref<75xf32, #tpu.memory_space<smem>>
    %c4_i32_161 = arith.constant 4 : i32
    %487 = arith.addi %474, %c4_i32_161 : i32
    %488 = arith.index_cast %487 : i32 to index
    %489 = memref.load %arg0[%488] : memref<75xf32, #tpu.memory_space<smem>>
    %490 = arith.truncf %473 : vector<2x8xf32> to vector<2x8xbf16>
    %cst_162 = arith.constant dense<0.000000e+00> : vector<2x32xf32>
    %491 = tpu.matmul %490, %0, %cst_162 {dimension_numbers = #tpu.dot_dimension_numbers<[1], [0], [0], [1], [0, 0, 1, 1], [], []>} : vector<2x8xbf16>, vector<8x32xbf16>, vector<2x32xf32> -> vector<2x32xf32>
    %492 = arith.index_cast %c10_i32 : i32 to index
    %c0_163 = arith.constant 0 : index
    %c0_164 = arith.constant 0 : index
    %493 = vector.load %arg3[%492, %c0_163, %c0_164] : memref<15x2x32xf32, #tpu.memory_space<vmem>>, vector<1x2x32xf32>
    %494 = vector.shape_cast %493 : vector<1x2x32xf32> to vector<2x32xf32>
    %495 = arith.addf %491, %494 : vector<2x32xf32>
    %cst_165 = arith.constant 0.000000e+00 : f32
    %496 = vector.broadcast %cst_165 : f32 to vector<2x32xf32>
    %497 = arith.maximumf %495, %496 : vector<2x32xf32>
    %498 = arith.truncf %497 : vector<2x32xf32> to vector<2x32xbf16>
    %cst_166 = arith.constant dense<0.000000e+00> : vector<2x8xf32>
    %499 = tpu.matmul %498, %1, %cst_166 {dimension_numbers = #tpu.dot_dimension_numbers<[1], [0], [0], [1], [0, 0, 1, 1], [], []>} : vector<2x32xbf16>, vector<32x8xbf16>, vector<2x8xf32> -> vector<2x8xf32>
    %500 = arith.addf %499, %2 : vector<2x8xf32>
    %501 = vector.broadcast %477 : f32 to vector<2x8xf32>
    %502 = arith.mulf %501, %473 : vector<2x8xf32>
    %503 = vector.broadcast %480 : f32 to vector<2x8xf32>
    %504 = arith.mulf %503, %500 : vector<2x8xf32>
    %505 = arith.subf %502, %504 : vector<2x8xf32>
    %cst_167 = arith.constant -1.000000e+00 : f32
    %cst_168 = arith.constant 1.000000e+00 : f32
    %506 = vector.broadcast %cst_167 : f32 to vector<2x8xf32>
    %507 = arith.maximumf %506, %505 : vector<2x8xf32>
    %508 = vector.broadcast %cst_168 : f32 to vector<2x8xf32>
    %509 = arith.minimumf %508, %507 : vector<2x8xf32>
    %510 = vector.broadcast %483 : f32 to vector<2x8xf32>
    %511 = arith.mulf %510, %509 : vector<2x8xf32>
    %512 = vector.broadcast %486 : f32 to vector<2x8xf32>
    %513 = arith.mulf %512, %473 : vector<2x8xf32>
    %514 = arith.addf %511, %513 : vector<2x8xf32>
    %515 = arith.index_cast %c10_i32 : i32 to index
    %c0_169 = arith.constant 0 : index
    %c0_170 = arith.constant 0 : index
    %516 = vector.load %arg2[%515, %c0_169, %c0_170] : memref<15x2x8xf32, #tpu.memory_space<vmem>>, vector<1x2x8xf32>
    %517 = vector.shape_cast %516 : vector<1x2x8xf32> to vector<2x8xf32>
    %518 = vector.broadcast %489 : f32 to vector<2x8xf32>
    %519 = arith.mulf %518, %517 : vector<2x8xf32>
    %520 = arith.addf %514, %519 : vector<2x8xf32>
    %c11_i32 = arith.constant 11 : i32
    %c5_i32_171 = arith.constant 5 : i32
    %521 = arith.muli %c11_i32, %c5_i32_171 : i32
    %c0_i32_172 = arith.constant 0 : i32
    %522 = arith.addi %521, %c0_i32_172 : i32
    %523 = arith.index_cast %522 : i32 to index
    %524 = memref.load %arg0[%523] : memref<75xf32, #tpu.memory_space<smem>>
    %c1_i32_173 = arith.constant 1 : i32
    %525 = arith.addi %521, %c1_i32_173 : i32
    %526 = arith.index_cast %525 : i32 to index
    %527 = memref.load %arg0[%526] : memref<75xf32, #tpu.memory_space<smem>>
    %c2_i32_174 = arith.constant 2 : i32
    %528 = arith.addi %521, %c2_i32_174 : i32
    %529 = arith.index_cast %528 : i32 to index
    %530 = memref.load %arg0[%529] : memref<75xf32, #tpu.memory_space<smem>>
    %c3_i32_175 = arith.constant 3 : i32
    %531 = arith.addi %521, %c3_i32_175 : i32
    %532 = arith.index_cast %531 : i32 to index
    %533 = memref.load %arg0[%532] : memref<75xf32, #tpu.memory_space<smem>>
    %c4_i32_176 = arith.constant 4 : i32
    %534 = arith.addi %521, %c4_i32_176 : i32
    %535 = arith.index_cast %534 : i32 to index
    %536 = memref.load %arg0[%535] : memref<75xf32, #tpu.memory_space<smem>>
    %537 = arith.truncf %520 : vector<2x8xf32> to vector<2x8xbf16>
    %cst_177 = arith.constant dense<0.000000e+00> : vector<2x32xf32>
    %538 = tpu.matmul %537, %0, %cst_177 {dimension_numbers = #tpu.dot_dimension_numbers<[1], [0], [0], [1], [0, 0, 1, 1], [], []>} : vector<2x8xbf16>, vector<8x32xbf16>, vector<2x32xf32> -> vector<2x32xf32>
    %539 = arith.index_cast %c11_i32 : i32 to index
    %c0_178 = arith.constant 0 : index
    %c0_179 = arith.constant 0 : index
    %540 = vector.load %arg3[%539, %c0_178, %c0_179] : memref<15x2x32xf32, #tpu.memory_space<vmem>>, vector<1x2x32xf32>
    %541 = vector.shape_cast %540 : vector<1x2x32xf32> to vector<2x32xf32>
    %542 = arith.addf %538, %541 : vector<2x32xf32>
    %cst_180 = arith.constant 0.000000e+00 : f32
    %543 = vector.broadcast %cst_180 : f32 to vector<2x32xf32>
    %544 = arith.maximumf %542, %543 : vector<2x32xf32>
    %545 = arith.truncf %544 : vector<2x32xf32> to vector<2x32xbf16>
    %cst_181 = arith.constant dense<0.000000e+00> : vector<2x8xf32>
    %546 = tpu.matmul %545, %1, %cst_181 {dimension_numbers = #tpu.dot_dimension_numbers<[1], [0], [0], [1], [0, 0, 1, 1], [], []>} : vector<2x32xbf16>, vector<32x8xbf16>, vector<2x8xf32> -> vector<2x8xf32>
    %547 = arith.addf %546, %2 : vector<2x8xf32>
    %548 = vector.broadcast %524 : f32 to vector<2x8xf32>
    %549 = arith.mulf %548, %520 : vector<2x8xf32>
    %550 = vector.broadcast %527 : f32 to vector<2x8xf32>
    %551 = arith.mulf %550, %547 : vector<2x8xf32>
    %552 = arith.subf %549, %551 : vector<2x8xf32>
    %cst_182 = arith.constant -1.000000e+00 : f32
    %cst_183 = arith.constant 1.000000e+00 : f32
    %553 = vector.broadcast %cst_182 : f32 to vector<2x8xf32>
    %554 = arith.maximumf %553, %552 : vector<2x8xf32>
    %555 = vector.broadcast %cst_183 : f32 to vector<2x8xf32>
    %556 = arith.minimumf %555, %554 : vector<2x8xf32>
    %557 = vector.broadcast %530 : f32 to vector<2x8xf32>
    %558 = arith.mulf %557, %556 : vector<2x8xf32>
    %559 = vector.broadcast %533 : f32 to vector<2x8xf32>
    %560 = arith.mulf %559, %520 : vector<2x8xf32>
    %561 = arith.addf %558, %560 : vector<2x8xf32>
    %562 = arith.index_cast %c11_i32 : i32 to index
    %c0_184 = arith.constant 0 : index
    %c0_185 = arith.constant 0 : index
    %563 = vector.load %arg2[%562, %c0_184, %c0_185] : memref<15x2x8xf32, #tpu.memory_space<vmem>>, vector<1x2x8xf32>
    %564 = vector.shape_cast %563 : vector<1x2x8xf32> to vector<2x8xf32>
    %565 = vector.broadcast %536 : f32 to vector<2x8xf32>
    %566 = arith.mulf %565, %564 : vector<2x8xf32>
    %567 = arith.addf %561, %566 : vector<2x8xf32>
    %c12_i32 = arith.constant 12 : i32
    %c5_i32_186 = arith.constant 5 : i32
    %568 = arith.muli %c12_i32, %c5_i32_186 : i32
    %c0_i32_187 = arith.constant 0 : i32
    %569 = arith.addi %568, %c0_i32_187 : i32
    %570 = arith.index_cast %569 : i32 to index
    %571 = memref.load %arg0[%570] : memref<75xf32, #tpu.memory_space<smem>>
    %c1_i32_188 = arith.constant 1 : i32
    %572 = arith.addi %568, %c1_i32_188 : i32
    %573 = arith.index_cast %572 : i32 to index
    %574 = memref.load %arg0[%573] : memref<75xf32, #tpu.memory_space<smem>>
    %c2_i32_189 = arith.constant 2 : i32
    %575 = arith.addi %568, %c2_i32_189 : i32
    %576 = arith.index_cast %575 : i32 to index
    %577 = memref.load %arg0[%576] : memref<75xf32, #tpu.memory_space<smem>>
    %c3_i32_190 = arith.constant 3 : i32
    %578 = arith.addi %568, %c3_i32_190 : i32
    %579 = arith.index_cast %578 : i32 to index
    %580 = memref.load %arg0[%579] : memref<75xf32, #tpu.memory_space<smem>>
    %c4_i32_191 = arith.constant 4 : i32
    %581 = arith.addi %568, %c4_i32_191 : i32
    %582 = arith.index_cast %581 : i32 to index
    %583 = memref.load %arg0[%582] : memref<75xf32, #tpu.memory_space<smem>>
    %584 = arith.truncf %567 : vector<2x8xf32> to vector<2x8xbf16>
    %cst_192 = arith.constant dense<0.000000e+00> : vector<2x32xf32>
    %585 = tpu.matmul %584, %0, %cst_192 {dimension_numbers = #tpu.dot_dimension_numbers<[1], [0], [0], [1], [0, 0, 1, 1], [], []>} : vector<2x8xbf16>, vector<8x32xbf16>, vector<2x32xf32> -> vector<2x32xf32>
    %586 = arith.index_cast %c12_i32 : i32 to index
    %c0_193 = arith.constant 0 : index
    %c0_194 = arith.constant 0 : index
    %587 = vector.load %arg3[%586, %c0_193, %c0_194] : memref<15x2x32xf32, #tpu.memory_space<vmem>>, vector<1x2x32xf32>
    %588 = vector.shape_cast %587 : vector<1x2x32xf32> to vector<2x32xf32>
    %589 = arith.addf %585, %588 : vector<2x32xf32>
    %cst_195 = arith.constant 0.000000e+00 : f32
    %590 = vector.broadcast %cst_195 : f32 to vector<2x32xf32>
    %591 = arith.maximumf %589, %590 : vector<2x32xf32>
    %592 = arith.truncf %591 : vector<2x32xf32> to vector<2x32xbf16>
    %cst_196 = arith.constant dense<0.000000e+00> : vector<2x8xf32>
    %593 = tpu.matmul %592, %1, %cst_196 {dimension_numbers = #tpu.dot_dimension_numbers<[1], [0], [0], [1], [0, 0, 1, 1], [], []>} : vector<2x32xbf16>, vector<32x8xbf16>, vector<2x8xf32> -> vector<2x8xf32>
    %594 = arith.addf %593, %2 : vector<2x8xf32>
    %595 = vector.broadcast %571 : f32 to vector<2x8xf32>
    %596 = arith.mulf %595, %567 : vector<2x8xf32>
    %597 = vector.broadcast %574 : f32 to vector<2x8xf32>
    %598 = arith.mulf %597, %594 : vector<2x8xf32>
    %599 = arith.subf %596, %598 : vector<2x8xf32>
    %cst_197 = arith.constant -1.000000e+00 : f32
    %cst_198 = arith.constant 1.000000e+00 : f32
    %600 = vector.broadcast %cst_197 : f32 to vector<2x8xf32>
    %601 = arith.maximumf %600, %599 : vector<2x8xf32>
    %602 = vector.broadcast %cst_198 : f32 to vector<2x8xf32>
    %603 = arith.minimumf %602, %601 : vector<2x8xf32>
    %604 = vector.broadcast %577 : f32 to vector<2x8xf32>
    %605 = arith.mulf %604, %603 : vector<2x8xf32>
    %606 = vector.broadcast %580 : f32 to vector<2x8xf32>
    %607 = arith.mulf %606, %567 : vector<2x8xf32>
    %608 = arith.addf %605, %607 : vector<2x8xf32>
    %609 = arith.index_cast %c12_i32 : i32 to index
    %c0_199 = arith.constant 0 : index
    %c0_200 = arith.constant 0 : index
    %610 = vector.load %arg2[%609, %c0_199, %c0_200] : memref<15x2x8xf32, #tpu.memory_space<vmem>>, vector<1x2x8xf32>
    %611 = vector.shape_cast %610 : vector<1x2x8xf32> to vector<2x8xf32>
    %612 = vector.broadcast %583 : f32 to vector<2x8xf32>
    %613 = arith.mulf %612, %611 : vector<2x8xf32>
    %614 = arith.addf %608, %613 : vector<2x8xf32>
    %c13_i32 = arith.constant 13 : i32
    %c5_i32_201 = arith.constant 5 : i32
    %615 = arith.muli %c13_i32, %c5_i32_201 : i32
    %c0_i32_202 = arith.constant 0 : i32
    %616 = arith.addi %615, %c0_i32_202 : i32
    %617 = arith.index_cast %616 : i32 to index
    %618 = memref.load %arg0[%617] : memref<75xf32, #tpu.memory_space<smem>>
    %c1_i32_203 = arith.constant 1 : i32
    %619 = arith.addi %615, %c1_i32_203 : i32
    %620 = arith.index_cast %619 : i32 to index
    %621 = memref.load %arg0[%620] : memref<75xf32, #tpu.memory_space<smem>>
    %c2_i32_204 = arith.constant 2 : i32
    %622 = arith.addi %615, %c2_i32_204 : i32
    %623 = arith.index_cast %622 : i32 to index
    %624 = memref.load %arg0[%623] : memref<75xf32, #tpu.memory_space<smem>>
    %c3_i32_205 = arith.constant 3 : i32
    %625 = arith.addi %615, %c3_i32_205 : i32
    %626 = arith.index_cast %625 : i32 to index
    %627 = memref.load %arg0[%626] : memref<75xf32, #tpu.memory_space<smem>>
    %c4_i32_206 = arith.constant 4 : i32
    %628 = arith.addi %615, %c4_i32_206 : i32
    %629 = arith.index_cast %628 : i32 to index
    %630 = memref.load %arg0[%629] : memref<75xf32, #tpu.memory_space<smem>>
    %631 = arith.truncf %614 : vector<2x8xf32> to vector<2x8xbf16>
    %cst_207 = arith.constant dense<0.000000e+00> : vector<2x32xf32>
    %632 = tpu.matmul %631, %0, %cst_207 {dimension_numbers = #tpu.dot_dimension_numbers<[1], [0], [0], [1], [0, 0, 1, 1], [], []>} : vector<2x8xbf16>, vector<8x32xbf16>, vector<2x32xf32> -> vector<2x32xf32>
    %633 = arith.index_cast %c13_i32 : i32 to index
    %c0_208 = arith.constant 0 : index
    %c0_209 = arith.constant 0 : index
    %634 = vector.load %arg3[%633, %c0_208, %c0_209] : memref<15x2x32xf32, #tpu.memory_space<vmem>>, vector<1x2x32xf32>
    %635 = vector.shape_cast %634 : vector<1x2x32xf32> to vector<2x32xf32>
    %636 = arith.addf %632, %635 : vector<2x32xf32>
    %cst_210 = arith.constant 0.000000e+00 : f32
    %637 = vector.broadcast %cst_210 : f32 to vector<2x32xf32>
    %638 = arith.maximumf %636, %637 : vector<2x32xf32>
    %639 = arith.truncf %638 : vector<2x32xf32> to vector<2x32xbf16>
    %cst_211 = arith.constant dense<0.000000e+00> : vector<2x8xf32>
    %640 = tpu.matmul %639, %1, %cst_211 {dimension_numbers = #tpu.dot_dimension_numbers<[1], [0], [0], [1], [0, 0, 1, 1], [], []>} : vector<2x32xbf16>, vector<32x8xbf16>, vector<2x8xf32> -> vector<2x8xf32>
    %641 = arith.addf %640, %2 : vector<2x8xf32>
    %642 = vector.broadcast %618 : f32 to vector<2x8xf32>
    %643 = arith.mulf %642, %614 : vector<2x8xf32>
    %644 = vector.broadcast %621 : f32 to vector<2x8xf32>
    %645 = arith.mulf %644, %641 : vector<2x8xf32>
    %646 = arith.subf %643, %645 : vector<2x8xf32>
    %cst_212 = arith.constant -1.000000e+00 : f32
    %cst_213 = arith.constant 1.000000e+00 : f32
    %647 = vector.broadcast %cst_212 : f32 to vector<2x8xf32>
    %648 = arith.maximumf %647, %646 : vector<2x8xf32>
    %649 = vector.broadcast %cst_213 : f32 to vector<2x8xf32>
    %650 = arith.minimumf %649, %648 : vector<2x8xf32>
    %651 = vector.broadcast %624 : f32 to vector<2x8xf32>
    %652 = arith.mulf %651, %650 : vector<2x8xf32>
    %653 = vector.broadcast %627 : f32 to vector<2x8xf32>
    %654 = arith.mulf %653, %614 : vector<2x8xf32>
    %655 = arith.addf %652, %654 : vector<2x8xf32>
    %656 = arith.index_cast %c13_i32 : i32 to index
    %c0_214 = arith.constant 0 : index
    %c0_215 = arith.constant 0 : index
    %657 = vector.load %arg2[%656, %c0_214, %c0_215] : memref<15x2x8xf32, #tpu.memory_space<vmem>>, vector<1x2x8xf32>
    %658 = vector.shape_cast %657 : vector<1x2x8xf32> to vector<2x8xf32>
    %659 = vector.broadcast %630 : f32 to vector<2x8xf32>
    %660 = arith.mulf %659, %658 : vector<2x8xf32>
    %661 = arith.addf %655, %660 : vector<2x8xf32>
    %c14_i32 = arith.constant 14 : i32
    %c5_i32_216 = arith.constant 5 : i32
    %662 = arith.muli %c14_i32, %c5_i32_216 : i32
    %c0_i32_217 = arith.constant 0 : i32
    %663 = arith.addi %662, %c0_i32_217 : i32
    %664 = arith.index_cast %663 : i32 to index
    %665 = memref.load %arg0[%664] : memref<75xf32, #tpu.memory_space<smem>>
    %c1_i32_218 = arith.constant 1 : i32
    %666 = arith.addi %662, %c1_i32_218 : i32
    %667 = arith.index_cast %666 : i32 to index
    %668 = memref.load %arg0[%667] : memref<75xf32, #tpu.memory_space<smem>>
    %c2_i32_219 = arith.constant 2 : i32
    %669 = arith.addi %662, %c2_i32_219 : i32
    %670 = arith.index_cast %669 : i32 to index
    %671 = memref.load %arg0[%670] : memref<75xf32, #tpu.memory_space<smem>>
    %c3_i32_220 = arith.constant 3 : i32
    %672 = arith.addi %662, %c3_i32_220 : i32
    %673 = arith.index_cast %672 : i32 to index
    %674 = memref.load %arg0[%673] : memref<75xf32, #tpu.memory_space<smem>>
    %c4_i32_221 = arith.constant 4 : i32
    %675 = arith.addi %662, %c4_i32_221 : i32
    %676 = arith.index_cast %675 : i32 to index
    %677 = memref.load %arg0[%676] : memref<75xf32, #tpu.memory_space<smem>>
    %678 = arith.truncf %661 : vector<2x8xf32> to vector<2x8xbf16>
    %cst_222 = arith.constant dense<0.000000e+00> : vector<2x32xf32>
    %679 = tpu.matmul %678, %0, %cst_222 {dimension_numbers = #tpu.dot_dimension_numbers<[1], [0], [0], [1], [0, 0, 1, 1], [], []>} : vector<2x8xbf16>, vector<8x32xbf16>, vector<2x32xf32> -> vector<2x32xf32>
    %680 = arith.index_cast %c14_i32 : i32 to index
    %c0_223 = arith.constant 0 : index
    %c0_224 = arith.constant 0 : index
    %681 = vector.load %arg3[%680, %c0_223, %c0_224] : memref<15x2x32xf32, #tpu.memory_space<vmem>>, vector<1x2x32xf32>
    %682 = vector.shape_cast %681 : vector<1x2x32xf32> to vector<2x32xf32>
    %683 = arith.addf %679, %682 : vector<2x32xf32>
    %cst_225 = arith.constant 0.000000e+00 : f32
    %684 = vector.broadcast %cst_225 : f32 to vector<2x32xf32>
    %685 = arith.maximumf %683, %684 : vector<2x32xf32>
    %686 = arith.truncf %685 : vector<2x32xf32> to vector<2x32xbf16>
    %cst_226 = arith.constant dense<0.000000e+00> : vector<2x8xf32>
    %687 = tpu.matmul %686, %1, %cst_226 {dimension_numbers = #tpu.dot_dimension_numbers<[1], [0], [0], [1], [0, 0, 1, 1], [], []>} : vector<2x32xbf16>, vector<32x8xbf16>, vector<2x8xf32> -> vector<2x8xf32>
    %688 = arith.addf %687, %2 : vector<2x8xf32>
    %689 = vector.broadcast %665 : f32 to vector<2x8xf32>
    %690 = arith.mulf %689, %661 : vector<2x8xf32>
    %691 = vector.broadcast %668 : f32 to vector<2x8xf32>
    %692 = arith.mulf %691, %688 : vector<2x8xf32>
    %693 = arith.subf %690, %692 : vector<2x8xf32>
    %cst_227 = arith.constant -1.000000e+00 : f32
    %cst_228 = arith.constant 1.000000e+00 : f32
    %694 = vector.broadcast %cst_227 : f32 to vector<2x8xf32>
    %695 = arith.maximumf %694, %693 : vector<2x8xf32>
    %696 = vector.broadcast %cst_228 : f32 to vector<2x8xf32>
    %697 = arith.minimumf %696, %695 : vector<2x8xf32>
    %698 = vector.broadcast %671 : f32 to vector<2x8xf32>
    %699 = arith.mulf %698, %697 : vector<2x8xf32>
    %700 = vector.broadcast %674 : f32 to vector<2x8xf32>
    %701 = arith.mulf %700, %661 : vector<2x8xf32>
    %702 = arith.addf %699, %701 : vector<2x8xf32>
    %703 = arith.index_cast %c14_i32 : i32 to index
    %c0_229 = arith.constant 0 : index
    %c0_230 = arith.constant 0 : index
    %704 = vector.load %arg2[%703, %c0_229, %c0_230] : memref<15x2x8xf32, #tpu.memory_space<vmem>>, vector<1x2x8xf32>
    %705 = vector.shape_cast %704 : vector<1x2x8xf32> to vector<2x8xf32>
    %706 = vector.broadcast %677 : f32 to vector<2x8xf32>
    %707 = arith.mulf %706, %705 : vector<2x8xf32>
    %708 = arith.addf %702, %707 : vector<2x8xf32>
    %c15_i32 = arith.constant 15 : i32
    %cst_231 = arith.constant -1.000000e+00 : f32
    %cst_232 = arith.constant 1.000000e+00 : f32
    %709 = vector.broadcast %cst_231 : f32 to vector<2x8xf32>
    %710 = arith.maximumf %709, %708 : vector<2x8xf32>
    %711 = vector.broadcast %cst_232 : f32 to vector<2x8xf32>
    %712 = arith.minimumf %711, %710 : vector<2x8xf32>
    %c0_233 = arith.constant 0 : index
    %c0_234 = arith.constant 0 : index
    %713 = vector.load %arg7[%c0_233, %c0_234] : memref<2x8xf32, #tpu.memory_space<vmem>>, vector<2x8xf32>
    tpu.vector_store %arg7[%c0_233, %c0_234], %712 {strides = array<i32>} : memref<2x8xf32, #tpu.memory_space<vmem>>, vector<2x8xf32>,
    return
  }
}

</mosaic_0001>

<bundles_post_ra>
// kernel: _sample_impl.1
= control target key start
LH: loop header
LB: loop body
LE: loop exit
PB: predicated region body
PF: predicated region fallthrough
CT: control target
= control target key end

     0   :  { %12 = vsyncpa [#allocation4], 0  ;;  %s2634_s0 = inlined_call_operand.vmem [shape: f32[75], index: 0, kind: input, shape index: {}]   ;;  %s2635_s1 = inlined_call_operand.vmem [shape: f32[2,8], index: 1, kind: input, shape index: {}]   ;;  %s2636_s2 = inlined_call_operand.vmem [shape: f32[15,2,8], index: 2, kind: input, shape index: {}]   ;;  %s2637_s3 = inlined_call_operand.vmem [shape: f32[15,2,32], index: 3, kind: input, shape index: {}]   ;;  %s2638_s4 = inlined_call_operand.vmem [shape: f32[2,8], index: 4, kind: input, shape index: {}]   ;;  %s2639_s5 = inlined_call_operand.vmem [shape: bf16[8,32], index: 5, kind: input, shape index: {}]   ;;  %s2640_s6 = inlined_call_operand.vmem [shape: bf16[32,8], index: 6, kind: input, shape index: {}]   ;;  %s2641_s7 = inlined_call_operand.hbm [shape: f32[2,8], index: 7, kind: output, shape index: {}]  }
   0x1   :  { %13 = vsyncpa [#allocation3], 0  ;;  %s20_s26 = sshll.u32 %s2634_s0, 4  ;;  %s21_s26 = int_to_ptr.vmem [resolvable:$true] %s20_s26 }
   0x2   :  { %s2222_s27 = scalar_lea.vmem %s21_s26, 16  ;;  %p2227_p1 = scmp.lt.s32.totalorder %s21_s26, %s21_s26 }
   0x3   :  { %p2223_p0 = scmp.ne.s32.totalorder %s21_s26, %s2222_s27  ;;  %p2228_p2 = scmp.lt.s32.totalorder %s2222_s27, %s2222_s27 }
   0x5   :  { %p2229_p3 = por %p2228_p2, %p2227_p1 }
   0x7   :  { %p2230_p4 = pnand %p2229_p3, %p2223_p0 }
   0x9   :  { %2233 = shalt.err (!%p2230_p4)
}
   0xa   :  { %s2260_s28 = smov [#allocation2]  }
   0xb   :  { %23 = dma.vmem_to_smem %s21_s26, 16, %s2260_s28, [#allocation4]  }
   0xc   :  { %2256 = dma.done.wait [#allocation4], 16  }
   0xd   :  { %2257 = vsyncadd [#allocation4], 4294967280 }
   0xe   :  { %39 = sfence }
   0xf   :  { %v41_v0 = vld [vmem:[%s2639_s5] sm:$0xf]  ;;  %vm59_vm0 = vcmask 1043456   ;;  %v2261_v1 = vmov 0.0   ;;  %vm2262_vm1 = vmmov 0   ;;  %vm55_vm2 = vcmask 64512  }
  0x10   :  { %2003 = vmatprep.subr.bf16.mxu0 %v2261_v1  ;;  %v2311_v2 = vsel %vm59_vm0, %v41_v0, 0  ;;  %2005 = vmatprep.mubr.msk.bf16.mxu0 %vm2262_vm1, %v2261_v1  ;;  %v47_v3 = vld [vmem:[%s2635_s1] sm:$0x3]  ;;  %v2338_v6 = vld [vmem:[%s2640_s6 + $0x8] sm:$0xff]   ;;  %vm117_vm3 = vcmask 261120   ;;  %s48_s13 = sld [smem:[#allocation2]] }
  0x11   :  { %2004 = vmatpush3.bf16.msra.mxu0 %v2311_v2  ;;  %v53_v4 = vpack.c.bf16 %v47_v3, %v47_v3  ;;  %2009 = vmatprep.subr.bf16.mxu1 %v2261_v1  ;;  %v2331_v5 = vld [vmem:[%s2640_s6] sm:$0xff]   ;;  %s1778_s14 = sld [smem:[#allocation2 + $0x1]]  ;;  %s1780_s15 = sld [smem:[#allocation2 + $0x3]]  ;;  %vm1761_vm4 = vcmask 58368  }
  0x12   :  { %2013 = vmatprep.mubr.msk.bf16.mxu1 %vm2262_vm1, %v2261_v1  ;;  %2017 = vmatprep.subr.bf16.mxu0 %v2261_v1  ;;  %v54_v7 = vld [vmem:[%s2637_s3] sm:$0x3]  ;;  %s1779_s18 = sld [smem:[#allocation2 + $0x2]]  ;;  %s1781_s19 = sld [smem:[#allocation2 + $0x4]]  ;;  %v1792_v37 = vld [vmem:[%s2637_s3 + $0x2] sm:$0x3] }
  0x13   :  { %2010 = vmatpush3.bf16.msra.mxu1 %v2331_v5  ;;  %v2355_v15 = vld [vmem:[%s2638_s4] sm:$0x3]  ;;  %s1787_s24 = sld [smem:[#allocation2 + $0x5]]  ;;  %s1788_s25 = sld [smem:[#allocation2 + $0x6]]  ;;  %v1796_v57 = vld [vmem:[%s2636_s2 + $0x2] sm:$0x3] }
  0x14   :  { %2006 = vmatmul.mubr.msk.bf16.vlgmr.msra.gmra.mrb[0].mxu0 %vm55_vm2, %v53_v4  ;;  %2011 = vmatprep.subr.bf16.mxu1 %v2261_v1  ;;  %v173_v28 = vld [vmem:[%s2636_s2] sm:$0x3]  ;;  %s1790_s26 = sld [smem:[#allocation2 + $0x8]]  ;;  %s1789_s27 = sld [smem:[#allocation2 + $0x7]]  ;;  %v1802_v4 = vld [vmem:[%s2637_s3 + $0x4] sm:$0x3] }
  0x15   :  { %2018 = vmatpush3.bf16.msra.mxu0 %v2311_v2  ;;  %2019 = vmatprep.mubr.msk.bf16.mxu0 %vm2262_vm1, %v2261_v1  ;;  %s1791_s28 = sld [smem:[#allocation2 + $0x9]]  ;;  %s1797_s1 = sld [smem:[#allocation2 + $0xa]] }
  0x16   :  { %2031 = vmatprep.subr.bf16.mxu0 %v2261_v1  ;;  %v161_v16 = vstv %s48_s13  ;;  %s1798_s5 = sld [smem:[#allocation2 + $0xb]]  ;;  %s1800_s9 = sld [smem:[#allocation2 + $0xd]] }
  0x17   :  { %2012 = vmatpush3.bf16.msra.mxu1 %v2338_v6  ;;  %v163_v18 = vstv %s1778_s14  ;;  %v162_v20 = vmul.f32 %v161_v16, %v47_v3  ;;  %v170_v25 = vstv %s1780_s15  ;;  %s1799_s10 = sld [smem:[#allocation2 + $0xc]]  ;;  %s1801_s11 = sld [smem:[#allocation2 + $0xe]] }
  0x18   :  { %2023 = vmatprep.subr.bf16.mxu1 %v2261_v1  ;;  %v168_v27 = vstv %s1779_s18  ;;  %v174_v29 = vstv %s1781_s19  ;;  %v171_v31 = vmul.f32 %v170_v25, %v47_v3  ;;  %s1807_s16 = sld [smem:[#allocation2 + $0xf]]  ;;  %s1808_s17 = sld [smem:[#allocation2 + $0x10]] }
  0x19   :  { %v175_v33 = vmul.f32 %v174_v29, %v173_v28  ;;  %v273_v46 = vstv %s1787_s24  ;;  %v275_v47 = vstv %s1788_s25  ;;  %s1810_s18 = sld [smem:[#allocation2 + $0x12]]  ;;  %s1809_s19 = sld [smem:[#allocation2 + $0x11]] }
  0x1a   :  { %v280_v55 = vstv %s1789_s27  ;;  %v282_v56 = vstv %s1790_s26  ;;  %s1811_s20 = sld [smem:[#allocation2 + $0x13]]  ;;  %s1817_s25 = sld [smem:[#allocation2 + $0x14]] }
  0x1b   :  { %v287_v58 = vstv %s1791_s28  ;;  %v386_v16 = vstv %s1797_s1  ;;  %s1818_s26 = sld [smem:[#allocation2 + $0x15]]  ;;  %s1820_s27 = sld [smem:[#allocation2 + $0x17]] }
  0x1c   :  { %v288_v62 = vmul.f32 %v1796_v57, %v287_v58  ;;  %s1819_s28 = sld [smem:[#allocation2 + $0x16]]  ;;  %s1821_s29 = sld [smem:[#allocation2 + $0x18]] }
  0x1d   :  { %v393_v25 = vstv %s1799_s10  ;;  %v400_v28 = vstv %s1801_s11  ;;  %s1830_s10 = sld [smem:[#allocation2 + $0x1c]]  ;;  %s1829_s11 = sld [smem:[#allocation2 + $0x1b]] }
  0x1e   :  { %s1831_s12 = sld [smem:[#allocation2 + $0x1d]]  ;;  %s1841_s21 = sld [smem:[#allocation2 + $0x22]] }
  0x1f   :  { %s1851_s30 = sld [smem:[#allocation2 + $0x27]]  ;;  %s1861_s13 = sld [smem:[#allocation2 + $0x2c]] }
  0x20   :  { %v513_v57 = vstv %s1811_s20  ;;  %s1839_s20 = sld [smem:[#allocation2 + $0x20]]  ;;  %s1871_s22 = sld [smem:[#allocation2 + $0x31]] }
  0x21   :  { %s1881_s0 = sld [smem:[#allocation2 + $0x36]]  ;;  %s1891_s14 = sld [smem:[#allocation2 + $0x3b]] }
  0x22   :  { %s1897_s23 = sld [smem:[#allocation2 + $0x3c]]  ;;  %s1898_s24 = sld [smem:[#allocation2 + $0x3d]] }
  0x23   :  { %s1907_s8 = sld [smem:[#allocation2 + $0x41]]  ;;  %s1908_s1 = sld [smem:[#allocation2 + $0x42]] }
  0x24   :  { %s1917_s15 = sld [smem:[#allocation2 + $0x46]] }
  0xe7   :  { %v97_v8 = vpop.f32.mrb[0].mxu0 }
  0xe8   :  { %v98_v9 = vadd.f32 %v97_v8, %v54_v7  ;;  %v2007_v10 = vpop.f32.mrb[1].mxu0 }
  0xe9   :  { %v100_v11 = vpop.f32.mrb[2].mxu0 }
  0xea   :  { %v103_v12 = vmax.f32 %v98_v9, 0.0  ;;  %v2008_v13 = vpop.f32.mrb[3].mxu0 }
  0xec   :  { %v104_v14 = vpack.c.bf16 %v103_v12, %v103_v12 }
  0xee   :  { %2014 = vmatmul.mubr.msk.bf16.vlgmr.msra.gmra.mrb[0].mxu1 %vm117_vm3, %v104_v14 }
  0xef   :  { %2024 = vmatpush3.bf16.msra.mxu1 %v2331_v5  ;;  %2027 = vmatprep.mubr.msk.bf16.mxu1 %vm2262_vm1, %v2261_v1 }
  0xf0   :  { %2025 = vmatprep.subr.bf16.mxu1 %v2261_v1 }
  0xf3   :  { %2026 = vmatpush3.bf16.msra.mxu1 %v2338_v6 }
  0xf4   :  { %2037 = vmatprep.subr.bf16.mxu1 %v2261_v1 }
 0x1c1   :  { %v155_v17 = vpop.f32.mrb[0].mxu1 }
 0x1c2   :  { %v156_v19 = vadd.f32 %v155_v17, %v2355_v15  ;;  %v2015_v21 = vpop.f32.mrb[1].mxu1  ;;  %v388_v17 = vstv %s1798_s5  ;;  %s1827_s5 = sld [smem:[#allocation2 + $0x19]] }
 0x1c3   :  { %v158_v22 = vpop.f32.mrb[2].mxu1 }
 0x1c4   :  { %v164_v23 = vmul.f32 %v163_v18, %v156_v19  ;;  %v2016_v24 = vpop.f32.mrb[3].mxu1 }
 0x1c6   :  { %v165_v26 = vsub.f32 %v162_v20, %v164_v23 }
 0x1c8   :  { %v1786_v30 = vclamps-f32 %v165_v26, 1.0  ;;  %v395_v26 = vstv %s1800_s9  ;;  %s1828_s9 = sld [smem:[#allocation2 + $0x1a]] }
 0x1ca   :  { %v169_v32 = vmul.f32 %v1786_v30, %v168_v27  ;;  %v1806_v27 = vld [vmem:[%s2636_s2 + $0x4] sm:$0x3] }
 0x1cc   :  { %v172_v34 = vadd.f32 %v171_v31, %v169_v32  ;;  %v401_v32 = vmul.f32 %v1806_v27, %v400_v28  ;;  %v626_v27 = vstv %s1821_s29  ;;  %s1849_s29 = sld [smem:[#allocation2 + $0x25]] }
 0x1ce   :  { %v176_v35 = vadd.f32 %v175_v33, %v172_v34 }
 0x1d0   :  { %v182_v36 = vpack.c.bf16 %v176_v35, %v176_v35  ;;  %v274_v51 = vmul.f32 %v273_v46, %v176_v35  ;;  %v283_v61 = vmul.f32 %v282_v56, %v176_v35  ;;  %v501_v46 = vstv %s1808_s17  ;;  %v1816_v56 = vld [vmem:[%s2636_s2 + $0x6] sm:$0x3]  ;;  %s1837_s17 = sld [smem:[#allocation2 + $0x1e]] }
 0x1d2   :  { %2020 = vmatmul.mubr.msk.bf16.vlgmr.msra.gmra.mrb[4].mxu0 %vm55_vm2, %v182_v36  ;;  %v1812_v36 = vld [vmem:[%s2637_s3 + $0x6] sm:$0x3] }
 0x1d3   :  { %2032 = vmatpush3.bf16.msra.mxu0 %v2311_v2  ;;  %2033 = vmatprep.mubr.msk.bf16.mxu0 %vm2262_vm1, %v2261_v1 }
 0x1d4   :  { %2045 = vmatprep.subr.bf16.mxu0 %v2261_v1 }
 0x2a5   :  { %v222_v38 = vpop.f32.mrb[4].mxu0 }
 0x2a6   :  { %v223_v39 = vadd.f32 %v1792_v37, %v222_v38  ;;  %v2021_v40 = vpop.f32.mrb[5].mxu0 }
 0x2a7   :  { %v225_v41 = vpop.f32.mrb[6].mxu0 }
 0x2a8   :  { %v228_v42 = vmax.f32 %v223_v39, 0.0  ;;  %v2022_v43 = vpop.f32.mrb[7].mxu0 }
 0x2aa   :  { %v229_v44 = vpack.c.bf16 %v228_v42, %v228_v42 }
 0x2ac   :  { %2028 = vmatmul.mubr.msk.bf16.vlgmr.msra.gmra.mrb[4].mxu1 %vm117_vm3, %v229_v44 }
 0x2ad   :  { %2038 = vmatpush3.bf16.msra.mxu1 %v2331_v5  ;;  %2041 = vmatprep.mubr.msk.bf16.mxu1 %vm2262_vm1, %v2261_v1 }
 0x2ae   :  { %2039 = vmatprep.subr.bf16.mxu1 %v2261_v1 }
 0x2b1   :  { %2040 = vmatpush3.bf16.msra.mxu1 %v2338_v6 }
 0x2b2   :  { %2051 = vmatprep.subr.bf16.mxu1 %v2261_v1 }
 0x37f   :  { %v267_v45 = vpop.f32.mrb[4].mxu1 }
 0x380   :  { %v268_v48 = vadd.f32 %v267_v45, %v2355_v15  ;;  %v2029_v49 = vpop.f32.mrb[5].mxu1  ;;  %v499_v45 = vstv %s1807_s16  ;;  %s1918_s16 = sld [smem:[#allocation2 + $0x47]] }
 0x381   :  { %v270_v50 = vpop.f32.mrb[6].mxu1 }
 0x382   :  { %v276_v52 = vmul.f32 %v275_v47, %v268_v48  ;;  %v2030_v53 = vpop.f32.mrb[7].mxu1 }
 0x384   :  { %v277_v54 = vsub.f32 %v274_v51, %v276_v52 }
 0x386   :  { %v1795_v59 = vclamps-f32 %v277_v54, 1.0  ;;  %v506_v54 = vstv %s1809_s19  ;;  %s1840_s19 = sld [smem:[#allocation2 + $0x21]] }
 0x388   :  { %v281_v60 = vmul.f32 %v1795_v59, %v280_v55  ;;  %v508_v55 = vstv %s1810_s18  ;;  %s1838_s18 = sld [smem:[#allocation2 + $0x1f]] }
 0x38a   :  { %v284_v63 = vadd.f32 %v283_v61, %v281_v60  ;;  %v514_v61 = vmul.f32 %v1816_v56, %v513_v57  ;;  %v739_v56 = vstv %s1831_s12  ;;  %s1859_s12 = sld [smem:[#allocation2 + $0x2a]] }
 0x38c   :  { %v289_v0 = vadd.f32 %v288_v62, %v284_v63 }
 0x38e   :  { %v295_v3 = vpack.c.bf16 %v289_v0, %v289_v0  ;;  %v387_v21 = vmul.f32 %v386_v16, %v289_v0  ;;  %v396_v31 = vmul.f32 %v395_v26, %v289_v0  ;;  %v614_v16 = vstv %s1818_s26  ;;  %v1826_v26 = vld [vmem:[%s2636_s2 + $0x8] sm:$0x3]  ;;  %s1847_s26 = sld [smem:[#allocation2 + $0x23]] }
 0x390   :  { %2034 = vmatmul.mubr.msk.bf16.vlgmr.msra.gmra.mrb[8].mxu0 %vm55_vm2, %v295_v3  ;;  %v1822_v3 = vld [vmem:[%s2637_s3 + $0x8] sm:$0x3] }
 0x391   :  { %2046 = vmatpush3.bf16.msra.mxu0 %v2311_v2  ;;  %2047 = vmatprep.mubr.msk.bf16.mxu0 %vm2262_vm1, %v2261_v1 }
 0x392   :  { %2059 = vmatprep.subr.bf16.mxu0 %v2261_v1 }
 0x463   :  { %v335_v7 = vpop.f32.mrb[8].mxu0 }
 0x464   :  { %v336_v8 = vadd.f32 %v1802_v4, %v335_v7  ;;  %v2035_v9 = vpop.f32.mrb[9].mxu0 }
 0x465   :  { %v338_v10 = vpop.f32.mrb[10].mxu0 }
 0x466   :  { %v341_v11 = vmax.f32 %v336_v8, 0.0  ;;  %v2036_v12 = vpop.f32.mrb[11].mxu0 }
 0x468   :  { %v342_v13 = vpack.c.bf16 %v341_v11, %v341_v11 }
 0x46a   :  { %2042 = vmatmul.mubr.msk.bf16.vlgmr.msra.gmra.mrb[8].mxu1 %vm117_vm3, %v342_v13 }
 0x46b   :  { %2052 = vmatpush3.bf16.msra.mxu1 %v2331_v5  ;;  %2055 = vmatprep.mubr.msk.bf16.mxu1 %vm2262_vm1, %v2261_v1 }
 0x46c   :  { %2053 = vmatprep.subr.bf16.mxu1 %v2261_v1 }
 0x46f   :  { %2054 = vmatpush3.bf16.msra.mxu1 %v2338_v6 }
 0x470   :  { %2065 = vmatprep.subr.bf16.mxu1 %v2261_v1 }
 0x53d   :  { %v380_v14 = vpop.f32.mrb[8].mxu1 }
 0x53e   :  { %v381_v18 = vadd.f32 %v380_v14, %v2355_v15  ;;  %v2043_v19 = vpop.f32.mrb[9].mxu1  ;;  %v612_v14 = vstv %s1817_s25  ;;  %s1900_s25 = sld [smem:[#allocation2 + $0x3f]] }
 0x53f   :  { %v383_v20 = vpop.f32.mrb[10].mxu1 }
 0x540   :  { %v389_v22 = vmul.f32 %v388_v17, %v381_v18  ;;  %v2044_v23 = vpop.f32.mrb[11].mxu1 }
 0x542   :  { %v390_v24 = vsub.f32 %v387_v21, %v389_v22 }
 0x544   :  { %v1805_v29 = vclamps-f32 %v390_v24, 1.0  ;;  %v619_v24 = vstv %s1819_s28  ;;  %s1850_s28 = sld [smem:[#allocation2 + $0x26]] }
 0x546   :  { %v394_v30 = vmul.f32 %v1805_v29, %v393_v25  ;;  %v621_v25 = vstv %s1820_s27  ;;  %s1848_s27 = sld [smem:[#allocation2 + $0x24]] }
 0x548   :  { %v397_v33 = vadd.f32 %v396_v31, %v394_v30  ;;  %v627_v31 = vmul.f32 %v1826_v26, %v626_v27  ;;  %v852_v26 = vstv %s1841_s21  ;;  %s1869_s21 = sld [smem:[#allocation2 + $0x2f]] }
 0x54a   :  { %v402_v34 = vadd.f32 %v401_v32, %v397_v33 }
 0x54c   :  { %v408_v35 = vpack.c.bf16 %v402_v34, %v402_v34  ;;  %v500_v50 = vmul.f32 %v499_v45, %v402_v34  ;;  %v509_v60 = vmul.f32 %v508_v55, %v402_v34  ;;  %v727_v45 = vstv %s1828_s9  ;;  %v1836_v55 = vld [vmem:[%s2636_s2 + $0xa] sm:$0x3]  ;;  %s1857_s9 = sld [smem:[#allocation2 + $0x28]] }
 0x54e   :  { %2048 = vmatmul.mubr.msk.bf16.vlgmr.msra.gmra.mrb[12].mxu0 %vm55_vm2, %v408_v35  ;;  %v1832_v35 = vld [vmem:[%s2637_s3 + $0xa] sm:$0x3] }
 0x54f   :  { %2060 = vmatpush3.bf16.msra.mxu0 %v2311_v2  ;;  %2061 = vmatprep.mubr.msk.bf16.mxu0 %vm2262_vm1, %v2261_v1 }
 0x550   :  { %2073 = vmatprep.subr.bf16.mxu0 %v2261_v1 }
 0x621   :  { %v448_v37 = vpop.f32.mrb[12].mxu0 }
 0x622   :  { %v449_v38 = vadd.f32 %v1812_v36, %v448_v37  ;;  %v2049_v39 = vpop.f32.mrb[13].mxu0 }
 0x623   :  { %v451_v40 = vpop.f32.mrb[14].mxu0 }
 0x624   :  { %v454_v41 = vmax.f32 %v449_v38, 0.0  ;;  %v2050_v42 = vpop.f32.mrb[15].mxu0 }
 0x626   :  { %v455_v43 = vpack.c.bf16 %v454_v41, %v454_v41 }
 0x628   :  { %2056 = vmatmul.mubr.msk.bf16.vlgmr.msra.gmra.mrb[12].mxu1 %vm117_vm3, %v455_v43 }
 0x629   :  { %2066 = vmatpush3.bf16.msra.mxu1 %v2331_v5  ;;  %2069 = vmatprep.mubr.msk.bf16.mxu1 %vm2262_vm1, %v2261_v1 }
 0x62a   :  { %2067 = vmatprep.subr.bf16.mxu1 %v2261_v1 }
 0x62d   :  { %2068 = vmatpush3.bf16.msra.mxu1 %v2338_v6 }
 0x62e   :  { %2079 = vmatprep.subr.bf16.mxu1 %v2261_v1 }
 0x6fb   :  { %v493_v44 = vpop.f32.mrb[12].mxu1 }
 0x6fc   :  { %v494_v47 = vadd.f32 %v493_v44, %v2355_v15  ;;  %v2057_v48 = vpop.f32.mrb[13].mxu1  ;;  %v725_v44 = vstv %s1827_s5  ;;  %s1910_s5 = sld [smem:[#allocation2 + $0x44]] }
 0x6fd   :  { %v496_v49 = vpop.f32.mrb[14].mxu1 }
 0x6fe   :  { %v502_v51 = vmul.f32 %v501_v46, %v494_v47  ;;  %v2058_v52 = vpop.f32.mrb[15].mxu1 }
 0x700   :  { %v503_v53 = vsub.f32 %v500_v50, %v502_v51 }
 0x702   :  { %v1815_v58 = vclamps-f32 %v503_v53, 1.0  ;;  %v732_v53 = vstv %s1829_s11  ;;  %s1860_s11 = sld [smem:[#allocation2 + $0x2b]] }
 0x704   :  { %v507_v59 = vmul.f32 %v1815_v58, %v506_v54  ;;  %v734_v54 = vstv %s1830_s10  ;;  %s1858_s10 = sld [smem:[#allocation2 + $0x29]] }
 0x706   :  { %v510_v62 = vadd.f32 %v509_v60, %v507_v59  ;;  %v740_v60 = vmul.f32 %v1836_v55, %v739_v56  ;;  %v965_v55 = vstv %s1851_s30  ;;  %s1879_s30 = sld [smem:[#allocation2 + $0x34]] }
 0x708   :  { %v515_v63 = vadd.f32 %v514_v61, %v510_v62 }
 0x70a   :  { %v521_v0 = vpack.c.bf16 %v515_v63, %v515_v63  ;;  %v613_v20 = vmul.f32 %v612_v14, %v515_v63  ;;  %v622_v30 = vmul.f32 %v621_v25, %v515_v63  ;;  %v840_v14 = vstv %s1838_s18  ;;  %v1846_v25 = vld [vmem:[%s2636_s2 + $0xc] sm:$0x3]  ;;  %s1867_s18 = sld [smem:[#allocation2 + $0x2d]] }
 0x70c   :  { %2062 = vmatmul.mubr.msk.bf16.vlgmr.msra.gmra.mrb[16].mxu0 %vm55_vm2, %v521_v0  ;;  %v1842_v0 = vld [vmem:[%s2637_s3 + $0xc] sm:$0x3] }
 0x70d   :  { %2074 = vmatpush3.bf16.msra.mxu0 %v2311_v2  ;;  %2075 = vmatprep.mubr.msk.bf16.mxu0 %vm2262_vm1, %v2261_v1 }
 0x70e   :  { %2087 = vmatprep.subr.bf16.mxu0 %v2261_v1 }
 0x7df   :  { %v561_v4 = vpop.f32.mrb[16].mxu0 }
 0x7e0   :  { %v562_v7 = vadd.f32 %v1822_v3, %v561_v4  ;;  %v2063_v8 = vpop.f32.mrb[17].mxu0 }
 0x7e1   :  { %v564_v9 = vpop.f32.mrb[18].mxu0 }
 0x7e2   :  { %v567_v10 = vmax.f32 %v562_v7, 0.0  ;;  %v2064_v11 = vpop.f32.mrb[19].mxu0 }
 0x7e4   :  { %v568_v12 = vpack.c.bf16 %v567_v10, %v567_v10 }
 0x7e6   :  { %2070 = vmatmul.mubr.msk.bf16.vlgmr.msra.gmra.mrb[16].mxu1 %vm117_vm3, %v568_v12 }
 0x7e7   :  { %2080 = vmatpush3.bf16.msra.mxu1 %v2331_v5  ;;  %2083 = vmatprep.mubr.msk.bf16.mxu1 %vm2262_vm1, %v2261_v1 }
 0x7e8   :  { %2081 = vmatprep.subr.bf16.mxu1 %v2261_v1 }
 0x7eb   :  { %2082 = vmatpush3.bf16.msra.mxu1 %v2338_v6 }
 0x7ec   :  { %2093 = vmatprep.subr.bf16.mxu1 %v2261_v1 }
 0x8b9   :  { %v606_v13 = vpop.f32.mrb[16].mxu1 }
 0x8ba   :  { %v607_v17 = vadd.f32 %v606_v13, %v2355_v15  ;;  %v2071_v18 = vpop.f32.mrb[17].mxu1  ;;  %v838_v13 = vstv %s1837_s17  ;;  %s1920_s17 = sld [smem:[#allocation2 + $0x49]] }
 0x8bb   :  { %v609_v19 = vpop.f32.mrb[18].mxu1 }
 0x8bc   :  { %v615_v21 = vmul.f32 %v614_v16, %v607_v17  ;;  %v2072_v22 = vpop.f32.mrb[19].mxu1 }
 0x8be   :  { %v616_v23 = vsub.f32 %v613_v20, %v615_v21 }
 0x8c0   :  { %v1825_v28 = vclamps-f32 %v616_v23, 1.0  ;;  %v845_v23 = vstv %s1839_s20  ;;  %s1870_s20 = sld [smem:[#allocation2 + $0x30]] }
 0x8c2   :  { %v620_v29 = vmul.f32 %v1825_v28, %v619_v24  ;;  %v847_v24 = vstv %s1840_s19  ;;  %s1868_s19 = sld [smem:[#allocation2 + $0x2e]] }
 0x8c4   :  { %v623_v32 = vadd.f32 %v622_v30, %v620_v29  ;;  %v853_v30 = vmul.f32 %v1846_v25, %v852_v26  ;;  %v1078_v25 = vstv %s1861_s13  ;;  %s1889_s13 = sld [smem:[#allocation2 + $0x39]] }
 0x8c6   :  { %v628_v33 = vadd.f32 %v627_v31, %v623_v32 }
 0x8c8   :  { %v634_v34 = vpack.c.bf16 %v628_v33, %v628_v33  ;;  %v726_v49 = vmul.f32 %v725_v44, %v628_v33  ;;  %v735_v59 = vmul.f32 %v734_v54, %v628_v33  ;;  %v953_v44 = vstv %s1848_s27  ;;  %v1856_v54 = vld [vmem:[%s2636_s2 + $0xe] sm:$0x3]  ;;  %s1877_s27 = sld [smem:[#allocation2 + $0x32]] }
 0x8ca   :  { %2076 = vmatmul.mubr.msk.bf16.vlgmr.msra.gmra.mrb[20].mxu0 %vm55_vm2, %v634_v34  ;;  %v1852_v34 = vld [vmem:[%s2637_s3 + $0xe] sm:$0x3] }
 0x8cb   :  { %2088 = vmatpush3.bf16.msra.mxu0 %v2311_v2  ;;  %2089 = vmatprep.mubr.msk.bf16.mxu0 %vm2262_vm1, %v2261_v1 }
 0x8cc   :  { %2101 = vmatprep.subr.bf16.mxu0 %v2261_v1 }
 0x99d   :  { %v674_v36 = vpop.f32.mrb[20].mxu0 }
 0x99e   :  { %v675_v37 = vadd.f32 %v1832_v35, %v674_v36  ;;  %v2077_v38 = vpop.f32.mrb[21].mxu0 }
 0x99f   :  { %v677_v39 = vpop.f32.mrb[22].mxu0 }
 0x9a0   :  { %v680_v40 = vmax.f32 %v675_v37, 0.0  ;;  %v2078_v41 = vpop.f32.mrb[23].mxu0 }
 0x9a2   :  { %v681_v42 = vpack.c.bf16 %v680_v40, %v680_v40 }
 0x9a4   :  { %2084 = vmatmul.mubr.msk.bf16.vlgmr.msra.gmra.mrb[20].mxu1 %vm117_vm3, %v681_v42 }
 0x9a5   :  { %2094 = vmatpush3.bf16.msra.mxu1 %v2331_v5  ;;  %2097 = vmatprep.mubr.msk.bf16.mxu1 %vm2262_vm1, %v2261_v1 }
 0x9a6   :  { %2095 = vmatprep.subr.bf16.mxu1 %v2261_v1 }
 0x9a9   :  { %2096 = vmatpush3.bf16.msra.mxu1 %v2338_v6 }
 0x9aa   :  { %2107 = vmatprep.subr.bf16.mxu1 %v2261_v1 }
 0xa77   :  { %v719_v43 = vpop.f32.mrb[20].mxu1 }
 0xa78   :  { %v720_v46 = vadd.f32 %v719_v43, %v2355_v15  ;;  %v2085_v47 = vpop.f32.mrb[21].mxu1  ;;  %v951_v43 = vstv %s1847_s26  ;;  %s1899_s26 = sld [smem:[#allocation2 + $0x3e]] }
 0xa79   :  { %v722_v48 = vpop.f32.mrb[22].mxu1 }
 0xa7a   :  { %v728_v50 = vmul.f32 %v727_v45, %v720_v46  ;;  %v2086_v51 = vpop.f32.mrb[23].mxu1 }
 0xa7c   :  { %v729_v52 = vsub.f32 %v726_v49, %v728_v50 }
 0xa7e   :  { %v1835_v57 = vclamps-f32 %v729_v52, 1.0  ;;  %v958_v52 = vstv %s1849_s29  ;;  %s1880_s29 = sld [smem:[#allocation2 + $0x35]] }
 0xa80   :  { %v733_v58 = vmul.f32 %v1835_v57, %v732_v53  ;;  %v960_v53 = vstv %s1850_s28  ;;  %s1878_s28 = sld [smem:[#allocation2 + $0x33]] }
 0xa82   :  { %v736_v61 = vadd.f32 %v735_v59, %v733_v58  ;;  %v966_v59 = vmul.f32 %v1856_v54, %v965_v55  ;;  %v1191_v54 = vstv %s1871_s22 }
 0xa84   :  { %v741_v62 = vadd.f32 %v740_v60, %v736_v61 }
 0xa86   :  { %v747_v63 = vpack.c.bf16 %v741_v62, %v741_v62  ;;  %v839_v19 = vmul.f32 %v838_v13, %v741_v62  ;;  %v848_v29 = vmul.f32 %v847_v24, %v741_v62  ;;  %v1066_v13 = vstv %s1858_s10  ;;  %v1866_v24 = vld [vmem:[%s2636_s2 + $0x10] sm:$0x3]  ;;  %s1887_s10 = sld [smem:[#allocation2 + $0x37]] }
 0xa88   :  { %2090 = vmatmul.mubr.msk.bf16.vlgmr.msra.gmra.mrb[24].mxu0 %vm55_vm2, %v747_v63  ;;  %v1862_v63 = vld [vmem:[%s2637_s3 + $0x10] sm:$0x3] }
 0xa89   :  { %2102 = vmatpush3.bf16.msra.mxu0 %v2311_v2  ;;  %2103 = vmatprep.mubr.msk.bf16.mxu0 %vm2262_vm1, %v2261_v1 }
 0xa8a   :  { %2115 = vmatprep.subr.bf16.mxu0 %v2261_v1 }
 0xb5b   :  { %v787_v3 = vpop.f32.mrb[24].mxu0 }
 0xb5c   :  { %v788_v4 = vadd.f32 %v1842_v0, %v787_v3  ;;  %v2091_v7 = vpop.f32.mrb[25].mxu0 }
 0xb5d   :  { %v790_v8 = vpop.f32.mrb[26].mxu0 }
 0xb5e   :  { %v793_v9 = vmax.f32 %v788_v4, 0.0  ;;  %v2092_v10 = vpop.f32.mrb[27].mxu0 }
 0xb60   :  { %v794_v11 = vpack.c.bf16 %v793_v9, %v793_v9 }
 0xb62   :  { %2098 = vmatmul.mubr.msk.bf16.vlgmr.msra.gmra.mrb[24].mxu1 %vm117_vm3, %v794_v11 }
 0xb63   :  { %2108 = vmatpush3.bf16.msra.mxu1 %v2331_v5  ;;  %2111 = vmatprep.mubr.msk.bf16.mxu1 %vm2262_vm1, %v2261_v1 }
 0xb64   :  { %2109 = vmatprep.subr.bf16.mxu1 %v2261_v1 }
 0xb67   :  { %2110 = vmatpush3.bf16.msra.mxu1 %v2338_v6 }
 0xb68   :  { %2121 = vmatprep.subr.bf16.mxu1 %v2261_v1 }
 0xc35   :  { %v832_v12 = vpop.f32.mrb[24].mxu1 }
 0xc36   :  { %v833_v16 = vadd.f32 %v832_v12, %v2355_v15  ;;  %v2099_v17 = vpop.f32.mrb[25].mxu1  ;;  %v1064_v12 = vstv %s1857_s9  ;;  %s1909_s9 = sld [smem:[#allocation2 + $0x43]] }
 0xc37   :  { %v835_v18 = vpop.f32.mrb[26].mxu1 }
 0xc38   :  { %v841_v20 = vmul.f32 %v840_v14, %v833_v16  ;;  %v2100_v21 = vpop.f32.mrb[27].mxu1 }
 0xc3a   :  { %v842_v22 = vsub.f32 %v839_v19, %v841_v20 }
 0xc3c   :  { %v1845_v27 = vclamps-f32 %v842_v22, 1.0  ;;  %v1071_v22 = vstv %s1859_s12  ;;  %s1890_s12 = sld [smem:[#allocation2 + $0x3a]] }
 0xc3e   :  { %v846_v28 = vmul.f32 %v1845_v27, %v845_v23  ;;  %v1073_v23 = vstv %s1860_s11  ;;  %s1888_s11 = sld [smem:[#allocation2 + $0x38]] }
 0xc40   :  { %v849_v31 = vadd.f32 %v848_v29, %v846_v28  ;;  %v1079_v29 = vmul.f32 %v1866_v24, %v1078_v25  ;;  %v1304_v24 = vstv %s1881_s0 }
 0xc42   :  { %v854_v32 = vadd.f32 %v853_v30, %v849_v31 }
 0xc44   :  { %v860_v33 = vpack.c.bf16 %v854_v32, %v854_v32  ;;  %v952_v48 = vmul.f32 %v951_v43, %v854_v32  ;;  %v961_v58 = vmul.f32 %v960_v53, %v854_v32  ;;  %v1179_v43 = vstv %s1868_s19  ;;  %v1876_v53 = vld [vmem:[%s2636_s2 + $0x12] sm:$0x3]  ;;  %s1921_s19 = sld [smem:[#allocation2 + $0x4a]] }
 0xc46   :  { %2104 = vmatmul.mubr.msk.bf16.vlgmr.msra.gmra.mrb[28].mxu0 %vm55_vm2, %v860_v33  ;;  %v1872_v33 = vld [vmem:[%s2637_s3 + $0x12] sm:$0x3] }
 0xc47   :  { %2116 = vmatpush3.bf16.msra.mxu0 %v2311_v2  ;;  %2117 = vmatprep.mubr.msk.bf16.mxu0 %vm2262_vm1, %v2261_v1 }
 0xc48   :  { %2129 = vmatprep.subr.bf16.mxu0 %v2261_v1 }
 0xd19   :  { %v900_v35 = vpop.f32.mrb[28].mxu0 }
 0xd1a   :  { %v901_v36 = vadd.f32 %v1852_v34, %v900_v35  ;;  %v2105_v37 = vpop.f32.mrb[29].mxu0 }
 0xd1b   :  { %v903_v38 = vpop.f32.mrb[30].mxu0 }
 0xd1c   :  { %v906_v39 = vmax.f32 %v901_v36, 0.0  ;;  %v2106_v40 = vpop.f32.mrb[31].mxu0 }
 0xd1e   :  { %v907_v41 = vpack.c.bf16 %v906_v39, %v906_v39 }
 0xd20   :  { %2112 = vmatmul.mubr.msk.bf16.vlgmr.msra.gmra.mrb[28].mxu1 %vm117_vm3, %v907_v41 }
 0xd21   :  { %2122 = vmatpush3.bf16.msra.mxu1 %v2331_v5  ;;  %2125 = vmatprep.mubr.msk.bf16.mxu1 %vm2262_vm1, %v2261_v1 }
 0xd22   :  { %2123 = vmatprep.subr.bf16.mxu1 %v2261_v1 }
 0xd25   :  { %2124 = vmatpush3.bf16.msra.mxu1 %v2338_v6 }
 0xd26   :  { %2135 = vmatprep.subr.bf16.mxu1 %v2261_v1 }
 0xdf3   :  { %v945_v42 = vpop.f32.mrb[28].mxu1 }
 0xdf4   :  { %v946_v45 = vadd.f32 %v945_v42, %v2355_v15  ;;  %v2113_v46 = vpop.f32.mrb[29].mxu1  ;;  %v1177_v42 = vstv %s1867_s18  ;;  %s1919_s18 = sld [smem:[#allocation2 + $0x48]] }
 0xdf5   :  { %v948_v47 = vpop.f32.mrb[30].mxu1 }
 0xdf6   :  { %v954_v49 = vmul.f32 %v953_v44, %v946_v45  ;;  %v2114_v50 = vpop.f32.mrb[31].mxu1 }
 0xdf8   :  { %v955_v51 = vsub.f32 %v952_v48, %v954_v49 }
 0xdfa   :  { %v1855_v56 = vclamps-f32 %v955_v51, 1.0  ;;  %v1184_v51 = vstv %s1869_s21  ;;  %s2263_s21 = smov [#allocation5]  }
 0xdfb   :  { %s1769_s22 = sshll.u32 %s2263_s21, 4  ;;  %s1770_s22 = int_to_ptr.vmem [resolvable:$true] %s1769_s22 }
 0xdfc   :  { %v959_v57 = vmul.f32 %v1855_v56, %v958_v52  ;;  %v1186_v52 = vstv %s1870_s20  ;;  %p2239_p6 = scmp.lt.s32.totalorder %s1770_s22, %s1770_s22 }
 0xdfe   :  { %v962_v60 = vadd.f32 %v961_v58, %v959_v57  ;;  %v1192_v58 = vmul.f32 %v1876_v53, %v1191_v54 }
 0xe00   :  { %v967_v61 = vadd.f32 %v966_v59, %v962_v60 }
 0xe02   :  { %v973_v62 = vpack.c.bf16 %v967_v61, %v967_v61  ;;  %v1065_v18 = vmul.f32 %v1064_v12, %v967_v61  ;;  %v1074_v28 = vmul.f32 %v1073_v23, %v967_v61  ;;  %v1292_v12 = vstv %s1878_s28  ;;  %v1886_v23 = vld [vmem:[%s2636_s2 + $0x14] sm:$0x3] }
 0xe04   :  { %2118 = vmatmul.mubr.msk.bf16.vlgmr.msra.gmra.mrb[32].mxu0 %vm55_vm2, %v973_v62  ;;  %v1882_v62 = vld [vmem:[%s2637_s3 + $0x14] sm:$0x3] }
 0xe05   :  { %2130 = vmatpush3.bf16.msra.mxu0 %v2311_v2  ;;  %2131 = vmatprep.mubr.msk.bf16.mxu0 %vm2262_vm1, %v2261_v1 }
 0xe06   :  { %2143 = vmatprep.subr.bf16.mxu0 %v2261_v1 }
 0xed7   :  { %v1013_v0 = vpop.f32.mrb[32].mxu0 }
 0xed8   :  { %v1014_v3 = vadd.f32 %v1862_v63, %v1013_v0  ;;  %v2119_v4 = vpop.f32.mrb[33].mxu0 }
 0xed9   :  { %v1016_v7 = vpop.f32.mrb[34].mxu0 }
 0xeda   :  { %v1019_v8 = vmax.f32 %v1014_v3, 0.0  ;;  %v2120_v9 = vpop.f32.mrb[35].mxu0 }
 0xedc   :  { %v1020_v10 = vpack.c.bf16 %v1019_v8, %v1019_v8 }
 0xede   :  { %2126 = vmatmul.mubr.msk.bf16.vlgmr.msra.gmra.mrb[32].mxu1 %vm117_vm3, %v1020_v10 }
 0xedf   :  { %2136 = vmatpush3.bf16.msra.mxu1 %v2331_v5  ;;  %2139 = vmatprep.mubr.msk.bf16.mxu1 %vm2262_vm1, %v2261_v1 }
 0xee0   :  { %2137 = vmatprep.subr.bf16.mxu1 %v2261_v1 }
 0xee3   :  { %2138 = vmatpush3.bf16.msra.mxu1 %v2338_v6 }
 0xee4   :  { %2149 = vmatprep.subr.bf16.mxu1 %v2261_v1 }
 0xfb1   :  { %v1058_v11 = vpop.f32.mrb[32].mxu1 }
 0xfb2   :  { %v1059_v14 = vadd.f32 %v1058_v11, %v2355_v15  ;;  %v2127_v16 = vpop.f32.mrb[33].mxu1  ;;  %v1290_v11 = vstv %s1877_s27  ;;  %s1901_s27 = sld [smem:[#allocation2 + $0x40]] }
 0xfb3   :  { %v1061_v17 = vpop.f32.mrb[34].mxu1 }
 0xfb4   :  { %v1067_v19 = vmul.f32 %v1066_v13, %v1059_v14  ;;  %v2128_v20 = vpop.f32.mrb[35].mxu1 }
 0xfb6   :  { %v1068_v21 = vsub.f32 %v1065_v18, %v1067_v19 }
 0xfb8   :  { %v1865_v26 = vclamps-f32 %v1068_v21, 1.0  ;;  %v1297_v21 = vstv %s1879_s30 }
 0xfba   :  { %v1072_v27 = vmul.f32 %v1865_v26, %v1071_v22  ;;  %v1299_v22 = vstv %s1880_s29 }
 0xfbc   :  { %v1075_v30 = vadd.f32 %v1074_v28, %v1072_v27  ;;  %v1305_v28 = vmul.f32 %v1886_v23, %v1304_v24  ;;  %v1530_v23 = vstv %s1901_s27 }
 0xfbe   :  { %v1080_v31 = vadd.f32 %v1079_v29, %v1075_v30 }
 0xfc0   :  { %v1086_v32 = vpack.c.bf16 %v1080_v31, %v1080_v31  ;;  %v1178_v47 = vmul.f32 %v1177_v42, %v1080_v31  ;;  %v1187_v57 = vmul.f32 %v1186_v52, %v1080_v31  ;;  %v1405_v42 = vstv %s1888_s11 }
 0xfc2   :  { %2132 = vmatmul.mubr.msk.bf16.vlgmr.msra.gmra.mrb[36].mxu0 %vm55_vm2, %v1086_v32  ;;  %v1892_v32 = vld [vmem:[%s2637_s3 + $0x16] sm:$0x3] }
 0xfc3   :  { %2144 = vmatpush3.bf16.msra.mxu0 %v2311_v2  ;;  %2145 = vmatprep.mubr.msk.bf16.mxu0 %vm2262_vm1, %v2261_v1 }
 0xfc4   :  { %2157 = vmatprep.subr.bf16.mxu0 %v2261_v1 }
0x1095   :  { %v1126_v34 = vpop.f32.mrb[36].mxu0 }
0x1096   :  { %v1127_v35 = vadd.f32 %v1872_v33, %v1126_v34  ;;  %v2133_v36 = vpop.f32.mrb[37].mxu0 }
0x1097   :  { %v1129_v37 = vpop.f32.mrb[38].mxu0 }
0x1098   :  { %v1132_v38 = vmax.f32 %v1127_v35, 0.0  ;;  %v2134_v39 = vpop.f32.mrb[39].mxu0 }
0x109a   :  { %v1133_v40 = vpack.c.bf16 %v1132_v38, %v1132_v38 }
0x109c   :  { %2140 = vmatmul.mubr.msk.bf16.vlgmr.msra.gmra.mrb[36].mxu1 %vm117_vm3, %v1133_v40 }
0x109d   :  { %2150 = vmatpush3.bf16.msra.mxu1 %v2331_v5  ;;  %2153 = vmatprep.mubr.msk.bf16.mxu1 %vm2262_vm1, %v2261_v1 }
0x109e   :  { %2151 = vmatprep.subr.bf16.mxu1 %v2261_v1 }
0x10a1   :  { %2152 = vmatpush3.bf16.msra.mxu1 %v2338_v6 }
0x10a2   :  { %2163 = vmatprep.subr.bf16.mxu1 %v2261_v1 }
0x116f   :  { %v1171_v41 = vpop.f32.mrb[36].mxu1 }
0x1170   :  { %v1172_v44 = vadd.f32 %v1171_v41, %v2355_v15  ;;  %v2141_v45 = vpop.f32.mrb[37].mxu1  ;;  %v1403_v41 = vstv %s1887_s10  ;;  %s1911_s10 = sld [smem:[#allocation2 + $0x45]] }
0x1171   :  { %v1174_v46 = vpop.f32.mrb[38].mxu1 }
0x1172   :  { %v1180_v48 = vmul.f32 %v1179_v43, %v1172_v44  ;;  %v2142_v49 = vpop.f32.mrb[39].mxu1 }
0x1173   :  { %v1410_v49 = vstv %s1889_s13 }
0x1174   :  { %v1181_v50 = vsub.f32 %v1178_v47, %v1180_v48 }
0x1176   :  { %v1875_v55 = vclamps-f32 %v1181_v50, 1.0  ;;  %v1896_v50 = vld [vmem:[%s2636_s2 + $0x16] sm:$0x3] }
0x1178   :  { %v1185_v56 = vmul.f32 %v1875_v55, %v1184_v51  ;;  %v1417_v51 = vstv %s1891_s14 }
0x1179   :  { %v1418_v55 = vmul.f32 %v1896_v50, %v1417_v51 }
0x117a   :  { %v1188_v59 = vadd.f32 %v1187_v57, %v1185_v56 }
0x117c   :  { %v1193_v60 = vadd.f32 %v1192_v58, %v1188_v59  ;;  %v1902_v58 = vld [vmem:[%s2637_s3 + $0x18] sm:$0x3] }
0x117e   :  { %v1199_v61 = vpack.c.bf16 %v1193_v60, %v1193_v60  ;;  %v1291_v17 = vmul.f32 %v1290_v11, %v1193_v60  ;;  %v1300_v27 = vmul.f32 %v1299_v22, %v1193_v60  ;;  %v2592_v11 = vld [vmem:[%s2638_s4] sm:$0x3]  ;;  %v1906_v22 = vld [vmem:[%s2636_s2 + $0x18] sm:$0x3] }
0x1180   :  { %2146 = vmatmul.mubr.msk.bf16.vlgmr.msra.gmra.mrb[40].mxu0 %vm55_vm2, %v1199_v61 }
0x1181   :  { %2158 = vmatpush3.bf16.msra.mxu0 %v2311_v2  ;;  %2159 = vmatprep.mubr.msk.bf16.mxu0 %vm2262_vm1, %v2261_v1 }
0x1182   :  { %2171 = vmatprep.subr.bf16.mxu0 %v2261_v1 }
0x1253   :  { %v1239_v63 = vpop.f32.mrb[40].mxu0 }
0x1254   :  { %v1240_v0 = vadd.f32 %v1882_v62, %v1239_v63  ;;  %v2147_v3 = vpop.f32.mrb[41].mxu0 }
0x1255   :  { %v1242_v4 = vpop.f32.mrb[42].mxu0 }
0x1256   :  { %v1245_v7 = vmax.f32 %v1240_v0, 0.0  ;;  %v2148_v8 = vpop.f32.mrb[43].mxu0  ;;  %v2219_v4 = vld [vmem:[%s2640_s6] sm:$0xff]  }
0x1258   :  { %v1246_v9 = vpack.c.bf16 %v1245_v7, %v1245_v7  ;;  %v2220_v7 = vld [vmem:[%s2640_s6 + $0x8] sm:$0xff]  }
0x125a   :  { %2154 = vmatmul.mubr.msk.bf16.vlgmr.msra.gmra.mrb[40].mxu1 %vm117_vm3, %v1246_v9  ;;  %v1516_v9 = vstv %s1897_s23  ;;  %s2234_s23 = scalar_lea.vmem %s1770_s22, 32 }
0x125b   :  { %2164 = vmatpush3.bf16.msra.mxu1 %v2331_v5  ;;  %2167 = vmatprep.mubr.msk.bf16.mxu1 %vm2262_vm1, %v2261_v1  ;;  %p2235_p5 = scmp.ne.s32.totalorder %s1770_s22, %s2234_s23  ;;  %p2240_p7 = scmp.lt.s32.totalorder %s2234_s23, %s2234_s23 }
0x125c   :  { %2165 = vmatprep.subr.bf16.mxu1 %v2261_v1 }
0x125d   :  { %p2241_p8 = por %p2240_p7, %p2239_p6 }
0x125f   :  { %2166 = vmatpush3.bf16.msra.mxu1 %v2338_v6  ;;  %p2242_p9 = pnand %p2241_p8, %p2235_p5 }
0x1260   :  { %2177 = vmatprep.subr.bf16.mxu1 %v2261_v1 }
0x132d   :  { %v1284_v10 = vpop.f32.mrb[40].mxu1 }
0x132e   :  { %v1285_v13 = vadd.f32 %v1284_v10, %v2355_v15  ;;  %v2155_v14 = vpop.f32.mrb[41].mxu1  ;;  %v1518_v10 = vstv %s1898_s24 }
0x132f   :  { %v1287_v16 = vpop.f32.mrb[42].mxu1 }
0x1330   :  { %v1293_v18 = vmul.f32 %v1292_v12, %v1285_v13  ;;  %v2156_v19 = vpop.f32.mrb[43].mxu1 }
0x1332   :  { %v1294_v20 = vsub.f32 %v1291_v17, %v1293_v18 }
0x1334   :  { %v1885_v25 = vclamps-f32 %v1294_v20, 1.0  ;;  %v1523_v20 = vstv %s1899_s26 }
0x1336   :  { %v1298_v26 = vmul.f32 %v1885_v25, %v1297_v21  ;;  %v1525_v21 = vstv %s1900_s25 }
0x1338   :  { %v1301_v29 = vadd.f32 %v1300_v27, %v1298_v26  ;;  %v1531_v27 = vmul.f32 %v1906_v22, %v1530_v23 }
0x133a   :  { %v1306_v30 = vadd.f32 %v1305_v28, %v1301_v29 }
0x133c   :  { %v1312_v31 = vpack.c.bf16 %v1306_v30, %v1306_v30  ;;  %v1404_v45 = vmul.f32 %v1403_v41, %v1306_v30 }
0x133e   :  { %2160 = vmatmul.mubr.msk.bf16.vlgmr.msra.gmra.mrb[44].mxu0 %vm55_vm2, %v1312_v31  ;;  %v1912_v31 = vld [vmem:[%s2637_s3 + $0x1a] sm:$0x3] }
0x133f   :  { %2172 = vmatpush3.bf16.msra.mxu0 %v2311_v2  ;;  %2173 = vmatprep.mubr.msk.bf16.mxu0 %vm2262_vm1, %v2261_v1 }
0x1340   :  { %2185 = vmatprep.subr.bf16.mxu0 %v2261_v1 }
0x1411   :  { %v1352_v33 = vpop.f32.mrb[44].mxu0 }
0x1412   :  { %v1353_v34 = vadd.f32 %v1892_v32, %v1352_v33  ;;  %v2161_v35 = vpop.f32.mrb[45].mxu0 }
0x1413   :  { %v1355_v36 = vpop.f32.mrb[46].mxu0 }
0x1414   :  { %v1358_v37 = vmax.f32 %v1353_v34, 0.0  ;;  %v2162_v38 = vpop.f32.mrb[47].mxu0 }
0x1416   :  { %v1359_v39 = vpack.c.bf16 %v1358_v37, %v1358_v37 }
0x1418   :  { %2168 = vmatmul.mubr.msk.bf16.vlgmr.msra.gmra.mrb[44].mxu1 %vm117_vm3, %v1359_v39  ;;  %v1629_v39 = vstv %s1907_s8 }
0x1419   :  { %2178 = vmatpush3.bf16.msra.mxu1 %v2331_v5  ;;  %2181 = vmatprep.mubr.msk.bf16.mxu1 %vm2262_vm1, %v2261_v1 }
0x141a   :  { %2179 = vmatprep.subr.bf16.mxu1 %v2261_v1 }
0x141d   :  { %2180 = vmatpush3.bf16.msra.mxu1 %v2338_v6  ;;  %v1412_v6 = vstv %s1890_s12 }
0x141e   :  { %2191 = vmatprep.subr.bf16.mxu1 %v2261_v1  ;;  %v1413_v54 = vmul.f32 %v1412_v6, %v1306_v30 }
0x14eb   :  { %v1397_v40 = vpop.f32.mrb[44].mxu1 }
0x14ec   :  { %v1398_v43 = vadd.f32 %v1397_v40, %v2355_v15  ;;  %v2169_v5 = vpop.f32.mrb[45].mxu1  ;;  %v1631_v40 = vstv %s1908_s1 }
0x14ed   :  { %v1400_v44 = vpop.f32.mrb[46].mxu1 }
0x14ee   :  { %v1406_v46 = vmul.f32 %v1405_v42, %v1398_v43  ;;  %v2170_v47 = vpop.f32.mrb[47].mxu1 }
0x14ef   :  { %v1636_v47 = vstv %s1909_s9 }
0x14f0   :  { %v1407_v48 = vsub.f32 %v1404_v45, %v1406_v46 }
0x14f2   :  { %v1895_v52 = vclamps-f32 %v1407_v48, 1.0  ;;  %v1638_v48 = vstv %s1910_s5 }
0x14f4   :  { %v1411_v53 = vmul.f32 %v1895_v52, %v1410_v49  ;;  %v1643_v49 = vstv %s1911_s10 }
0x14f6   :  { %v1414_v56 = vadd.f32 %v1413_v54, %v1411_v53 }
0x14f8   :  { %v1419_v57 = vadd.f32 %v1418_v55, %v1414_v56  ;;  %v1922_v56 = vld [vmem:[%s2637_s3 + $0x1c] sm:$0x3] }
0x14fa   :  { %v1425_v15 = vpack.c.bf16 %v1419_v57, %v1419_v57  ;;  %v1517_v16 = vmul.f32 %v1516_v9, %v1419_v57  ;;  %v1526_v26 = vmul.f32 %v1525_v21, %v1419_v57 }
0x14fc   :  { %2174 = vmatmul.mubr.msk.bf16.vlgmr.msra.gmra.mrb[48].mxu0 %vm55_vm2, %v1425_v15 }
0x14fd   :  { %2186 = vmatpush3.bf16.msra.mxu0 %v2311_v2  ;;  %2187 = vmatprep.mubr.msk.bf16.mxu0 %vm2262_vm1, %v2261_v1 }
0x14fe   :  { %2199 = vmatprep.subr.bf16.mxu0 %v2261_v1 }
0x15cf   :  { %v1465_v59 = vpop.f32.mrb[48].mxu0 }
0x15d0   :  { %v1466_v60 = vadd.f32 %v1902_v58, %v1465_v59  ;;  %v2175_v61 = vpop.f32.mrb[49].mxu0 }
0x15d1   :  { %v1468_v62 = vpop.f32.mrb[50].mxu0 }
0x15d2   :  { %v1471_v63 = vmax.f32 %v1466_v60, 0.0  ;;  %v2176_v0 = vpop.f32.mrb[51].mxu0 }
0x15d3   :  { %v1742_v0 = vstv %s1917_s15 }
0x15d4   :  { %v1472_v3 = vpack.c.bf16 %v1471_v63, %v1471_v63 }
0x15d6   :  { %2182 = vmatmul.mubr.msk.bf16.vlgmr.msra.gmra.mrb[48].mxu1 %vm117_vm3, %v1472_v3  ;;  %v1744_v3 = vstv %s1918_s16 }
0x15d7   :  { %2192 = vmatpush3.bf16.msra.mxu1 %v2219_v4  ;;  %2195 = vmatprep.mubr.msk.bf16.mxu1 %vm2262_vm1, %v2261_v1 }
0x15d8   :  { %2193 = vmatprep.subr.bf16.mxu1 %v2261_v1 }
0x15db   :  { %2194 = vmatpush3.bf16.msra.mxu1 %v2220_v7 }
0x15dc   :  { %2205 = vmatprep.subr.bf16.mxu1 %v2261_v1 }
0x16a9   :  { %v1510_v8 = vpop.f32.mrb[48].mxu1 }
0x16aa   :  { %v1511_v12 = vadd.f32 %v2592_v11, %v1510_v8  ;;  %v2183_v13 = vpop.f32.mrb[49].mxu1 }
0x16ab   :  { %v1513_v14 = vpop.f32.mrb[50].mxu1 }
0x16ac   :  { %v1519_v17 = vmul.f32 %v1518_v10, %v1511_v12  ;;  %v2184_v18 = vpop.f32.mrb[51].mxu1  ;;  %v1749_v14 = vstv %s1919_s18 }
0x16ad   :  { %v1756_v18 = vstv %s1921_s19 }
0x16ae   :  { %v1520_v19 = vsub.f32 %v1517_v16, %v1519_v17  ;;  %v1751_v16 = vstv %s1920_s17  ;;  %v1926_v17 = vld [vmem:[%s2636_s2 + $0x1c] sm:$0x3] }
0x16af   :  { %v1757_v22 = vmul.f32 %v1926_v17, %v1756_v18 }
0x16b0   :  { %v1905_v24 = vclamps-f32 %v1520_v19, 1.0 }
0x16b2   :  { %v1524_v25 = vmul.f32 %v1905_v24, %v1523_v20 }
0x16b4   :  { %v1527_v28 = vadd.f32 %v1526_v26, %v1524_v25 }
0x16b6   :  { %v1532_v29 = vadd.f32 %v1531_v27, %v1527_v28 }
0x16b8   :  { %v1538_v30 = vpack.c.bf16 %v1532_v29, %v1532_v29  ;;  %v1630_v5 = vmul.f32 %v1629_v39, %v1532_v29  ;;  %v1639_v51 = vmul.f32 %v1638_v48, %v1532_v29 }
0x16ba   :  { %2188 = vmatmul.mubr.msk.bf16.vlgmr.msra.gmra.mrb[52].mxu0 %vm55_vm2, %v1538_v30 }
0x16bb   :  { %2200 = vmatpush3.bf16.msra.mxu0 %v2311_v2  ;;  %2201 = vmatprep.mubr.msk.bf16.mxu0 %vm2262_vm1, %v2261_v1 }
0x178d   :  { %v1578_v32 = vpop.f32.mrb[52].mxu0 }
0x178e   :  { %v1579_v33 = vadd.f32 %v1912_v31, %v1578_v32  ;;  %v2189_v34 = vpop.f32.mrb[53].mxu0 }
0x178f   :  { %v1581_v35 = vpop.f32.mrb[54].mxu0 }
0x1790   :  { %v1584_v36 = vmax.f32 %v1579_v33, 0.0  ;;  %v2190_v37 = vpop.f32.mrb[55].mxu0 }
0x1792   :  { %v1585_v38 = vpack.c.bf16 %v1584_v36, %v1584_v36 }
0x1794   :  { %2196 = vmatmul.mubr.msk.bf16.vlgmr.msra.gmra.mrb[52].mxu1 %vm117_vm3, %v1585_v38 }
0x1795   :  { %2206 = vmatpush3.bf16.msra.mxu1 %v2219_v4  ;;  %2209 = vmatprep.mubr.msk.bf16.mxu1 %vm2262_vm1, %v2261_v1 }
0x1796   :  { %2207 = vmatprep.subr.bf16.mxu1 %v2261_v1  ;;  %v1916_v1 = vld [vmem:[%s2636_s2 + $0x1a] sm:$0x3] }
0x1797   :  { %v1644_v52 = vmul.f32 %v1916_v1, %v1643_v49 }
0x1799   :  { %2208 = vmatpush3.bf16.msra.mxu1 %v2220_v7 }
0x1867   :  { %v1623_v2 = vpop.f32.mrb[52].mxu1 }
0x1868   :  { %v1624_v41 = vadd.f32 %v2592_v11, %v1623_v2  ;;  %v2197_v42 = vpop.f32.mrb[53].mxu1 }
0x1869   :  { %v1626_v43 = vpop.f32.mrb[54].mxu1 }
0x186a   :  { %v1632_v44 = vmul.f32 %v1631_v40, %v1624_v41  ;;  %v2198_v45 = vpop.f32.mrb[55].mxu1 }
0x186c   :  { %v1633_v46 = vsub.f32 %v1630_v5, %v1632_v44 }
0x186e   :  { %v1915_v6 = vclamps-f32 %v1633_v46, 1.0 }
0x1870   :  { %v1637_v50 = vmul.f32 %v1915_v6, %v1636_v47 }
0x1872   :  { %v1640_v53 = vadd.f32 %v1639_v51, %v1637_v50 }
0x1874   :  { %v1645_v54 = vadd.f32 %v1644_v52, %v1640_v53 }
0x1876   :  { %v1651_v55 = vpack.c.bf16 %v1645_v54, %v1645_v54  ;;  %v1743_v9 = vmul.f32 %v1742_v0, %v1645_v54  ;;  %v1752_v21 = vmul.f32 %v1751_v16, %v1645_v54 }
0x1878   :  { %2202 = vmatmul.mubr.msk.bf16.vlgmr.msra.gmra.mrb[56].mxu0 %vm55_vm2, %v1651_v55 }
0x194b   :  { %v1691_v57 = vpop.f32.mrb[56].mxu0 }
0x194c   :  { %v1692_v15 = vadd.f32 %v1922_v56, %v1691_v57  ;;  %v2203_v58 = vpop.f32.mrb[57].mxu0 }
0x194d   :  { %v1694_v59 = vpop.f32.mrb[58].mxu0 }
0x194e   :  { %v1697_v60 = vmax.f32 %v1692_v15, 0.0  ;;  %v2204_v61 = vpop.f32.mrb[59].mxu0 }
0x1950   :  { %v1698_v62 = vpack.c.bf16 %v1697_v60, %v1697_v60 }
0x1952   :  { %2210 = vmatmul.mubr.msk.bf16.vlgmr.msra.gmra.mrb[56].mxu1 %vm117_vm3, %v1698_v62 }
0x1a25   :  { %v1736_v63 = vpop.f32.mrb[56].mxu1 }
0x1a26   :  { %v1737_v4 = vadd.f32 %v2592_v11, %v1736_v63  ;;  %v2211_v7 = vpop.f32.mrb[57].mxu1 }
0x1a27   :  { %v1739_v8 = vpop.f32.mrb[58].mxu1 }
0x1a28   :  { %v1745_v10 = vmul.f32 %v1744_v3, %v1737_v4  ;;  %v2212_v12 = vpop.f32.mrb[59].mxu1 }
0x1a2a   :  { %v1746_v13 = vsub.f32 %v1743_v9, %v1745_v10 }
0x1a2c   :  { %v1925_v19 = vclamps-f32 %v1746_v13, 1.0 }
0x1a2e   :  { %v1750_v20 = vmul.f32 %v1925_v19, %v1749_v14 }
0x1a30   :  { %v1753_v23 = vadd.f32 %v1752_v21, %v1750_v20 }
0x1a32   :  { %v1758_v11 = vadd.f32 %v1757_v22, %v1753_v23 }
0x1a34   :  { %v1927_v24 = vclamps-f32 %v1758_v11, 1.0 }
0x1a36   :  { %1762 = vst.msk [vmem:[#allocation5] sm:$0x3] %vm1761_vm4, %v1927_v24 }
0x1a37   :  { %2245 = shalt.err (!%p2242_p9)
}
0x1a38   :  { %s2246_s25 = scalar_lea.hbm %s2641_s7, 32 }
0x1a39   :  { %p2247_p10 = scmp.ne.s32.totalorder %s2641_s7, %s2246_s25  ;;  %p2250_p11 = scmp.lt.u32.totalorder %s2246_s25, %s2641_s7 }
0x1a3b   :  { %p2252_p12 = pnand %p2250_p11, %p2247_p10 }
0x1a3d   :  { %2255 = shalt.err (!%p2252_p12)
}
0x1a3e   :  { %1772 = dma.vmem_to_hbm [thread:$0]  %s1770_s22, 32, %s2641_s7, [#allocation3]  }
0x1a3f   :  { %2258 = dma.done.wait [#allocation3], 32  }
0x1a40   :  { %2259 = vsyncadd [#allocation3], 4294967264 }
0x1a41   :  { %1776 = vsyncpa [#allocation3], 1 }
0x1a42   :  { %1777 = vsyncpa [#allocation4], 1 }

</bundles_post_ra>
